<compile_context>
chip_gen: v6e
topology: v6e:2x2x1
jax: 0.10.0
libtpu: 0.0.40
codegen_flags: <defaults>
</compile_context>

<pallas_src>
import math

import jax
import jax.numpy as jnp
from jax.experimental import pallas as pl
from jax.experimental.pallas import tpu as pltpu


def _round_up(x, m):
    return (x + m - 1) // m * m


# ----------------------------------------------------------------------------
# Pallas kernel: one grid step == TB batch elements.
# Fuses: mask construction, attention layer 1 (all rows), attention layer 2
# (cls row only) and the final linear projection.
# ----------------------------------------------------------------------------
def prompt_kernel(x_ref,
                  wqkv1_ref, bqkv1_ref, wd1_ref, bd1_ref,
                  wqkv2_ref, bqkv2_ref, wd2_ref, bd2_ref,
                  wl_ref, bl_ref,
                  out_ref):
    TB, SP, E = x_ref.shape
    dk = wqkv1_ref.shape[1] // 3          # 32 (hard-coded in the module)
    scale = 1.0 / math.sqrt(dk)
    neg_big = -1000000000.0

    x = x_ref[...]                        # (TB, SP, E) f32
    x2d = x.reshape(TB * SP, E)           # sublane-aligned merge (SP % 8 == 0)

    # padding_mask = (init_hidden != 0) + 0.0 ; mask = pm @ pm^T  (per batch)
    pm = (x != 0.0).astype(jnp.float32)                                   # (TB, SP, E)
    mask = jnp.einsum('bqe,bke->bqk', pm, pm,
                      preferred_element_type=jnp.float32)                 # (TB, SP, SP)

    # ------------------------- attention layer 1 (all rows) -----------------
    qkv1 = jnp.dot(x2d, wqkv1_ref[...],
                   preferred_element_type=jnp.float32) + bqkv1_ref[...]   # (TB*SP, 3*dk)
    qkv1 = qkv1.reshape(TB, SP, 3 * dk)
    q1 = qkv1[..., 0:dk]
    k1 = qkv1[..., dk:2 * dk]
    v1 = qkv1[..., 2 * dk:3 * dk]

    s1 = jnp.einsum('bqd,bkd->bqk', q1, k1,
                    preferred_element_type=jnp.float32) * scale           # (TB, SP, SP)
    s1 = jnp.where(mask == 0.0, neg_big, s1)
    s1 = s1 - jnp.max(s1, axis=-1, keepdims=True)
    e1 = jnp.exp(s1)
    p1 = e1 * pl.reciprocal(jnp.sum(e1, axis=-1, keepdims=True), approx=True)
    o1 = jnp.einsum('bqk,bkd->bqd', p1, v1,
                    preferred_element_type=jnp.float32)                   # (TB, SP, dk)
    # TODO(synk): nn.Dropout(0.1) after dense is identity in eval mode; omitted.
    h1 = jnp.dot(o1.reshape(TB * SP, dk), wd1_ref[...],
                 preferred_element_type=jnp.float32) + bd1_ref[...]       # (TB*SP, H)

    # ---------------------- attention layer 2 (cls row only) ----------------
    qkv2 = jnp.dot(h1, wqkv2_ref[...],
                   preferred_element_type=jnp.float32) + bqkv2_ref[...]   # (TB*SP, 3*dk)
    qkv2 = qkv2.reshape(TB, SP, 3 * dk)
    q2 = qkv2[:, 0:1, 0:dk]                                               # (TB, 1, dk)
    k2 = qkv2[..., dk:2 * dk]
    v2 = qkv2[..., 2 * dk:3 * dk]

    s2 = jnp.einsum('bqd,bkd->bqk', q2, k2,
                    preferred_element_type=jnp.float32) * scale           # (TB, 1, SP)
    s2 = jnp.where(mask[:, 0:1, :] == 0.0, neg_big, s2)
    s2 = s2 - jnp.max(s2, axis=-1, keepdims=True)
    e2 = jnp.exp(s2)
    p2 = e2 * pl.reciprocal(jnp.sum(e2, axis=-1, keepdims=True), approx=True)
    o2 = jnp.einsum('bqk,bkd->bqd', p2, v2,
                    preferred_element_type=jnp.float32).reshape(TB, dk)   # (TB, dk)
    h2_cls = jnp.dot(o2, wd2_ref[...],
                     preferred_element_type=jnp.float32) + bd2_ref[...]   # (TB, H)

    # final linear on the cls hidden state -> dense (TB, H) store
    out_ref[...] = jnp.dot(h2_cls, wl_ref[...],
                           preferred_element_type=jnp.float32) + bl_ref[...]


# ----------------------------------------------------------------------------
# Wrapper: stacking, cls / zero padding, QKV fusion, pallas_call plumbing.
# ----------------------------------------------------------------------------
def prompt_generator_forward(feature_map, params, *, batch_block=32):
    B = feature_map[0].shape[0]
    E = params["cls"].shape[-1]
    H = params["w_lin"].shape[-1]
    N = len(feature_map)

    # Sequence padding (cls + N features) to a multiple of 8 for sublane
    # alignment; padded rows are zero so the padding mask excludes them.
    SP = _round_up(N + 1, 8)

    # Batch blocking: TB >= 8 rows per grid step, capped at `batch_block`.
    TB = min(batch_block, _round_up(B, 8))
    B_pad = _round_up(B, TB)

    feat = jnp.stack(feature_map, axis=1).astype(jnp.float32)             # (B, N, E)
    feat = jnp.pad(feat, ((0, B_pad - B), (0, 0), (0, 0)))
    cls_rows = jnp.broadcast_to(params["cls"][None, :, :].astype(jnp.float32),
                                (B_pad, 1, E))
    seq_pad = jnp.zeros((B_pad, SP - 1 - N, E), jnp.float32)
    x = jnp.concatenate([cls_rows, feat, seq_pad], axis=1)                # (B_pad, SP, E)
    # TODO(synk): this concat could be moved in-kernel (pass feat + cls refs)
    # to save one HBM round trip; kept in XLA for lowering robustness.

    # Fuse Q/K/V per layer into one (H, 96) weight / (1, 96) bias slab.
    wqkv1 = jnp.concatenate([params["wq1"], params["wk1"], params["wv1"]], axis=1)
    bqkv1 = jnp.concatenate([params["bq1"], params["bk1"], params["bv1"]], axis=1)
    wqkv2 = jnp.concatenate([params["wq2"], params["wk2"], params["wv2"]], axis=1)
    bqkv2 = jnp.concatenate([params["bq2"], params["bk2"], params["bv2"]], axis=1)
    weights = [wqkv1, bqkv1, params["wd1"], params["bd1"],
               wqkv2, bqkv2, params["wd2"], params["bd2"],
               params["w_lin"], params["b_lin"]]

    def full_spec(a):
        return pl.BlockSpec(a.shape, lambda b, _n=a.ndim: (0,) * _n)

    grid = (B_pad // TB,)
    in_specs = ([pl.BlockSpec((TB, SP, E), lambda b: (b, 0, 0))]
                + [full_spec(a) for a in weights])
    out_spec = pl.BlockSpec((TB, H), lambda b: (b, 0))

    out = pl.pallas_call(
        prompt_kernel,
        out_shape=jax.ShapeDtypeStruct((B_pad, H), jnp.float32),
        grid=grid,
        in_specs=in_specs,
        out_specs=out_spec,
        compiler_params=pltpu.CompilerParams(dimension_semantics=("parallel",)),
    )(x, *weights)
    return out[:B]                                                        # (B, H)


# ----------------------------------------------------------------------------
# Deterministic parameter init (shapes from the module's __init__).
# ----------------------------------------------------------------------------
def init_params(key, embedding_size, hidden_size):
    assert embedding_size == hidden_size, "module requires embedding_size == hidden_size"
    E, H = embedding_size, hidden_size
    keys = iter(jax.random.split(key, 16))

    def linear(k, fan_in, fan_out):
        k1, k2 = jax.random.split(k)
        bound = 1.0 / math.sqrt(fan_in)
        w = jax.random.uniform(k1, (fan_in, fan_out), jnp.float32, -bound, bound)
        b = jax.random.uniform(k2, (1, fan_out), jnp.float32, -bound, bound)
        return w, b

    p = {"cls": jax.random.normal(next(keys), (1, E), jnp.float32)}
    for layer in ("1", "2"):
        p["wq" + layer], p["bq" + layer] = linear(next(keys), H, 32)
        p["wk" + layer], p["bk" + layer] = linear(next(keys), H, 32)
        p["wv" + layer], p["bv" + layer] = linear(next(keys), H, 32)
        p["wd" + layer], p["bd" + layer] = linear(next(keys), 32, H)
    p["w_lin"], p["b_lin"] = linear(next(keys), E, H)
    return p


# ----------------------------------------------------------------------------
# Pure-JAX reference (mirrors the PyTorch forward, eval mode).
# ----------------------------------------------------------------------------
def reference_forward(feature_map, params):
    B = feature_map[0].shape[0]
    E = params["cls"].shape[-1]
    feat = jnp.stack(feature_map, axis=1)
    x0 = jnp.zeros((B, 1, E), jnp.float32)
    concat = jnp.concatenate([x0, feat], axis=1)
    concat = concat.at[:, 0, :].set(jnp.broadcast_to(params["cls"], (B, E)))
    init = concat

    pm = (init != 0.0).astype(jnp.float32)
    mask = jnp.matmul(pm, jnp.swapaxes(pm, -1, -2))

    def layer(h, sfx):
        q = h @ params["wq" + sfx] + params["bq" + sfx]
        k = h @ params["wk" + sfx] + params["bk" + sfx]
        v = h @ params["wv" + sfx] + params["bv" + sfx]
        scores = jnp.matmul(q, jnp.swapaxes(k, -1, -2)) / math.sqrt(q.shape[-1])
        scores = jnp.where(mask == 0.0, -1000000000.0, scores)
        p_attn = jax.nn.softmax(scores, axis=-1)
        o = jnp.matmul(p_attn, v)
        return o @ params["wd" + sfx] + params["bd" + sfx]

    h = layer(concat, "1")
    h = layer(h, "2")
    cls_hidden = h[:, 0]
    return cls_hidden @ params["w_lin"] + params["b_lin"][0]


if __name__ == "__main__":
    B, N, E, H = 2, 4, 32, 32          # batch, num feature maps, embedding/hidden size
    key = jax.random.PRNGKey(0)
    kp, kf = jax.random.split(key)
    params = init_params(kp, E, H)
    fkeys = jax.random.split(kf, N)
    feature_map = [jax.random.normal(fkeys[i], (B, E), jnp.float32) for i in range(N)]

    out = prompt_generator_forward(feature_map, params)
    out = jax.block_until_ready(out)

    ref = reference_forward(feature_map, params)
    assert out.shape == (B, H), out.shape
    # 1e-3 tolerance: pl.reciprocal(approx=True) in the softmax adds ~1e-4
    # relative error vs the exact-division reference.
    assert jnp.allclose(out, ref, rtol=1e-3, atol=1e-3), float(jnp.max(jnp.abs(out - ref)))
    print("KERNEL_OK")
</pallas_src>

<mosaic_0001>
module attributes {stable_mosaic.version = 11 : i64} {
  func.func @prompt_kernel(%arg0: i32, %arg1: memref<8x8x32xf32, #tpu.memory_space<vmem>>, %arg2: memref<32x96xf32, #tpu.memory_space<vmem>>, %arg3: memref<1x96xf32, #tpu.memory_space<vmem>>, %arg4: memref<32x32xf32, #tpu.memory_space<vmem>>, %arg5: memref<1x32xf32, #tpu.memory_space<vmem>>, %arg6: memref<32x96xf32, #tpu.memory_space<vmem>>, %arg7: memref<1x96xf32, #tpu.memory_space<vmem>>, %arg8: memref<32x32xf32, #tpu.memory_space<vmem>>, %arg9: memref<1x32xf32, #tpu.memory_space<vmem>>, %arg10: memref<32x32xf32, #tpu.memory_space<vmem>>, %arg11: memref<1x32xf32, #tpu.memory_space<vmem>>, %arg12: memref<8x32xf32, #tpu.memory_space<vmem>>) attributes {dimension_semantics = [#tpu.dimension_semantics<parallel>], iteration_bounds = array<i64: 1>, scalar_prefetch = 0 : i64, scratch_operands = 0 : i64, tpu.core_type = #tpu.core_type<tc>, window_params = [{transform_indices = @transform_0, window_bounds = array<i64: 8, 8, 32>}, {pipeline_mode = #tpu.pipeline_mode<synchronous>, transform_indices = @transform_1, window_bounds = array<i64: 32, 96>}, {pipeline_mode = #tpu.pipeline_mode<synchronous>, transform_indices = @transform_2, window_bounds = array<i64: 1, 96>}, {pipeline_mode = #tpu.pipeline_mode<synchronous>, transform_indices = @transform_3, window_bounds = array<i64: 32, 32>}, {pipeline_mode = #tpu.pipeline_mode<synchronous>, transform_indices = @transform_4, window_bounds = array<i64: 1, 32>}, {pipeline_mode = #tpu.pipeline_mode<synchronous>, transform_indices = @transform_5, window_bounds = array<i64: 32, 96>}, {pipeline_mode = #tpu.pipeline_mode<synchronous>, transform_indices = @transform_6, window_bounds = array<i64: 1, 96>}, {pipeline_mode = #tpu.pipeline_mode<synchronous>, transform_indices = @transform_7, window_bounds = array<i64: 32, 32>}, {pipeline_mode = #tpu.pipeline_mode<synchronous>, transform_indices = @transform_8, window_bounds = array<i64: 1, 32>}, {pipeline_mode = #tpu.pipeline_mode<synchronous>, transform_indices = @transform_9, window_bounds = array<i64: 32, 32>}, {pipeline_mode = #tpu.pipeline_mode<synchronous>, transform_indices = @transform_10, window_bounds = array<i64: 1, 32>}, {transform_indices = @transform_11, window_bounds = array<i64: 8, 32>}]} {
    %c0 = arith.constant 0 : index
    %c0_0 = arith.constant 0 : index
    %c0_1 = arith.constant 0 : index
    %0 = vector.load %arg1[%c0, %c0_0, %c0_1] : memref<8x8x32xf32, #tpu.memory_space<vmem>>, vector<8x8x32xf32>
    %1 = vector.shape_cast %0 : vector<8x8x32xf32> to vector<64x32xf32>
    %cst = arith.constant 0.000000e+00 : f32
    %2 = vector.broadcast %cst : f32 to vector<8x8x32xf32>
    %3 = arith.cmpf one, %0, %2 : vector<8x8x32xf32>
    %4 = arith.extui %3 : vector<8x8x32xi1> to vector<8x8x32xi32>
    %5 = arith.sitofp %4 : vector<8x8x32xi32> to vector<8x8x32xf32>
    "tpu.trace_start"() <{level = 10 : i32, message = "bqe,bke->bqk"}> : () -> ()
    %cst_2 = arith.constant dense<0.000000e+00> : vector<8x8x8xf32>
    %6 = tpu.matmul %5, %5, %cst_2 {dimension_numbers = #tpu.dot_dimension_numbers<[2], [2], [1], [1], [0, 0, 0, 1, 1, 1], [0], [0]>} : vector<8x8x32xf32>, vector<8x8x32xf32>, vector<8x8x8xf32> -> vector<8x8x8xf32>
    "tpu.trace_stop"() : () -> ()
    %c0_3 = arith.constant 0 : index
    %c0_4 = arith.constant 0 : index
    %7 = vector.load %arg2[%c0_3, %c0_4] : memref<32x96xf32, #tpu.memory_space<vmem>>, vector<32x96xf32>
    %cst_5 = arith.constant dense<0.000000e+00> : vector<64x96xf32>
    %8 = tpu.matmul %1, %7, %cst_5 {dimension_numbers = #tpu.dot_dimension_numbers<[1], [0], [0], [1], [0, 0, 1, 1], [], []>} : vector<64x32xf32>, vector<32x96xf32>, vector<64x96xf32> -> vector<64x96xf32>
    %c0_6 = arith.constant 0 : index
    %c0_7 = arith.constant 0 : index
    %9 = vector.load %arg3[%c0_6, %c0_7] : memref<1x96xf32, #tpu.memory_space<vmem>>, vector<1x96xf32>
    %10 = vector.broadcast %9 : vector<1x96xf32> to vector<64x96xf32>
    %11 = arith.addf %8, %10 : vector<64x96xf32>
    %12 = vector.shape_cast %11 : vector<64x96xf32> to vector<8x8x96xf32>
    %13 = vector.extract_strided_slice %12 {offsets = [0, 0, 0], sizes = [8, 8, 32], strides = [1, 1, 1]} : vector<8x8x96xf32> to vector<8x8x32xf32>
    %14 = vector.extract_strided_slice %12 {offsets = [0, 0, 32], sizes = [8, 8, 32], strides = [1, 1, 1]} : vector<8x8x96xf32> to vector<8x8x32xf32>
    %15 = vector.extract_strided_slice %12 {offsets = [0, 0, 64], sizes = [8, 8, 32], strides = [1, 1, 1]} : vector<8x8x96xf32> to vector<8x8x32xf32>
    "tpu.trace_start"() <{level = 10 : i32, message = "bqd,bkd->bqk"}> : () -> ()
    %cst_8 = arith.constant dense<0.000000e+00> : vector<8x8x8xf32>
    %16 = tpu.matmul %13, %14, %cst_8 {dimension_numbers = #tpu.dot_dimension_numbers<[2], [2], [1], [1], [0, 0, 0, 1, 1, 1], [0], [0]>} : vector<8x8x32xf32>, vector<8x8x32xf32>, vector<8x8x8xf32> -> vector<8x8x8xf32>
    "tpu.trace_stop"() : () -> ()
    %cst_9 = arith.constant 0.176776692 : f32
    %17 = vector.broadcast %cst_9 : f32 to vector<8x8x8xf32>
    %18 = arith.mulf %16, %17 : vector<8x8x8xf32>
    %cst_10 = arith.constant 0.000000e+00 : f32
    %19 = vector.broadcast %cst_10 : f32 to vector<8x8x8xf32>
    %20 = arith.cmpf oeq, %6, %19 : vector<8x8x8xf32>
    %cst_11 = arith.constant -1.000000e+09 : f32
    %21 = vector.broadcast %cst_11 : f32 to vector<8x8x8xf32>
    %22 = arith.select %20, %21, %18 : vector<8x8x8xi1>, vector<8x8x8xf32>
    %cst_12 = arith.constant dense<0xFF800000> : vector<8x8xf32>
    %23 = vector.multi_reduction <maximumf>, %22, %cst_12 [2] : vector<8x8x8xf32> to vector<8x8xf32>
    %24 = vector.shape_cast %23 : vector<8x8xf32> to vector<8x8x1xf32>
    %25 = vector.broadcast %24 : vector<8x8x1xf32> to vector<8x8x8xf32>
    %26 = arith.subf %22, %25 : vector<8x8x8xf32>
    %27 = math.exp %26 : vector<8x8x8xf32>
    %cst_13 = arith.constant dense<0.000000e+00> : vector<8x8xf32>
    %28 = vector.multi_reduction <add>, %27, %cst_13 [2] : vector<8x8x8xf32> to vector<8x8xf32>
    %29 = vector.shape_cast %28 : vector<8x8xf32> to vector<8x8x1xf32>
    %30 = tpu.reciprocal %29 {approx = true} : vector<8x8x1xf32> -> vector<8x8x1xf32>
    %31 = vector.broadcast %30 : vector<8x8x1xf32> to vector<8x8x8xf32>
    %32 = arith.mulf %27, %31 : vector<8x8x8xf32>
    "tpu.trace_start"() <{level = 10 : i32, message = "bqk,bkd->bqd"}> : () -> ()
    %cst_14 = arith.constant dense<0.000000e+00> : vector<8x8x32xf32>
    %33 = tpu.matmul %32, %15, %cst_14 {dimension_numbers = #tpu.dot_dimension_numbers<[2], [1], [1], [2], [0, 0, 0, 1, 1, 2], [0], [0]>} : vector<8x8x8xf32>, vector<8x8x32xf32>, vector<8x8x32xf32> -> vector<8x8x32xf32>
    "tpu.trace_stop"() : () -> ()
    %34 = vector.shape_cast %33 : vector<8x8x32xf32> to vector<64x32xf32>
    %c0_15 = arith.constant 0 : index
    %c0_16 = arith.constant 0 : index
    %35 = vector.load %arg4[%c0_15, %c0_16] : memref<32x32xf32, #tpu.memory_space<vmem>>, vector<32x32xf32>
    %cst_17 = arith.constant dense<0.000000e+00> : vector<64x32xf32>
    %36 = tpu.matmul %34, %35, %cst_17 {dimension_numbers = #tpu.dot_dimension_numbers<[1], [0], [0], [1], [0, 0, 1, 1], [], []>} : vector<64x32xf32>, vector<32x32xf32>, vector<64x32xf32> -> vector<64x32xf32>
    %c0_18 = arith.constant 0 : index
    %c0_19 = arith.constant 0 : index
    %37 = vector.load %arg5[%c0_18, %c0_19] : memref<1x32xf32, #tpu.memory_space<vmem>>, vector<1x32xf32>
    %38 = vector.broadcast %37 : vector<1x32xf32> to vector<64x32xf32>
    %39 = arith.addf %36, %38 : vector<64x32xf32>
    %c0_20 = arith.constant 0 : index
    %c0_21 = arith.constant 0 : index
    %40 = vector.load %arg6[%c0_20, %c0_21] : memref<32x96xf32, #tpu.memory_space<vmem>>, vector<32x96xf32>
    %cst_22 = arith.constant dense<0.000000e+00> : vector<64x96xf32>
    %41 = tpu.matmul %39, %40, %cst_22 {dimension_numbers = #tpu.dot_dimension_numbers<[1], [0], [0], [1], [0, 0, 1, 1], [], []>} : vector<64x32xf32>, vector<32x96xf32>, vector<64x96xf32> -> vector<64x96xf32>
    %c0_23 = arith.constant 0 : index
    %c0_24 = arith.constant 0 : index
    %42 = vector.load %arg7[%c0_23, %c0_24] : memref<1x96xf32, #tpu.memory_space<vmem>>, vector<1x96xf32>
    %43 = vector.broadcast %42 : vector<1x96xf32> to vector<64x96xf32>
    %44 = arith.addf %41, %43 : vector<64x96xf32>
    %45 = vector.shape_cast %44 : vector<64x96xf32> to vector<8x8x96xf32>
    %46 = vector.extract_strided_slice %45 {offsets = [0, 0, 0], sizes = [8, 1, 32], strides = [1, 1, 1]} : vector<8x8x96xf32> to vector<8x1x32xf32>
    %47 = vector.extract_strided_slice %45 {offsets = [0, 0, 32], sizes = [8, 8, 32], strides = [1, 1, 1]} : vector<8x8x96xf32> to vector<8x8x32xf32>
    %48 = vector.extract_strided_slice %45 {offsets = [0, 0, 64], sizes = [8, 8, 32], strides = [1, 1, 1]} : vector<8x8x96xf32> to vector<8x8x32xf32>
    "tpu.trace_start"() <{level = 10 : i32, message = "bqd,bkd->bqk"}> : () -> ()
    %cst_25 = arith.constant dense<0.000000e+00> : vector<8x1x8xf32>
    %49 = tpu.matmul %46, %47, %cst_25 {dimension_numbers = #tpu.dot_dimension_numbers<[2], [2], [1], [1], [0, 0, 0, 1, 1, 1], [0], [0]>} : vector<8x1x32xf32>, vector<8x8x32xf32>, vector<8x1x8xf32> -> vector<8x1x8xf32>
    "tpu.trace_stop"() : () -> ()
    %cst_26 = arith.constant 0.176776692 : f32
    %50 = vector.broadcast %cst_26 : f32 to vector<8x1x8xf32>
    %51 = arith.mulf %49, %50 : vector<8x1x8xf32>
    %52 = vector.extract_strided_slice %6 {offsets = [0, 0, 0], sizes = [8, 1, 8], strides = [1, 1, 1]} : vector<8x8x8xf32> to vector<8x1x8xf32>
    %cst_27 = arith.constant 0.000000e+00 : f32
    %53 = vector.broadcast %cst_27 : f32 to vector<8x1x8xf32>
    %54 = arith.cmpf oeq, %52, %53 : vector<8x1x8xf32>
    %cst_28 = arith.constant -1.000000e+09 : f32
    %55 = vector.broadcast %cst_28 : f32 to vector<8x1x8xf32>
    %56 = arith.select %54, %55, %51 : vector<8x1x8xi1>, vector<8x1x8xf32>
    %cst_29 = arith.constant dense<0xFF800000> : vector<8x1xf32>
    %57 = vector.multi_reduction <maximumf>, %56, %cst_29 [2] : vector<8x1x8xf32> to vector<8x1xf32>
    %58 = vector.shape_cast %57 : vector<8x1xf32> to vector<8x1x1xf32>
    %59 = vector.broadcast %58 : vector<8x1x1xf32> to vector<8x1x8xf32>
    %60 = arith.subf %56, %59 : vector<8x1x8xf32>
    %61 = math.exp %60 : vector<8x1x8xf32>
    %cst_30 = arith.constant dense<0.000000e+00> : vector<8x1xf32>
    %62 = vector.multi_reduction <add>, %61, %cst_30 [2] : vector<8x1x8xf32> to vector<8x1xf32>
    %63 = vector.shape_cast %62 : vector<8x1xf32> to vector<8x1x1xf32>
    %64 = tpu.reciprocal %63 {approx = true} : vector<8x1x1xf32> -> vector<8x1x1xf32>
    %65 = vector.broadcast %64 : vector<8x1x1xf32> to vector<8x1x8xf32>
    %66 = arith.mulf %61, %65 : vector<8x1x8xf32>
    "tpu.trace_start"() <{level = 10 : i32, message = "bqk,bkd->bqd"}> : () -> ()
    %cst_31 = arith.constant dense<0.000000e+00> : vector<8x1x32xf32>
    %67 = tpu.matmul %66, %48, %cst_31 {dimension_numbers = #tpu.dot_dimension_numbers<[2], [1], [1], [2], [0, 0, 0, 1, 1, 2], [0], [0]>} : vector<8x1x8xf32>, vector<8x8x32xf32>, vector<8x1x32xf32> -> vector<8x1x32xf32>
    "tpu.trace_stop"() : () -> ()
    %68 = vector.shape_cast %67 : vector<8x1x32xf32> to vector<8x32xf32>
    %c0_32 = arith.constant 0 : index
    %c0_33 = arith.constant 0 : index
    %69 = vector.load %arg8[%c0_32, %c0_33] : memref<32x32xf32, #tpu.memory_space<vmem>>, vector<32x32xf32>
    %cst_34 = arith.constant dense<0.000000e+00> : vector<8x32xf32>
    %70 = tpu.matmul %68, %69, %cst_34 {dimension_numbers = #tpu.dot_dimension_numbers<[1], [0], [0], [1], [0, 0, 1, 1], [], []>} : vector<8x32xf32>, vector<32x32xf32>, vector<8x32xf32> -> vector<8x32xf32>
    %c0_35 = arith.constant 0 : index
    %c0_36 = arith.constant 0 : index
    %71 = vector.load %arg9[%c0_35, %c0_36] : memref<1x32xf32, #tpu.memory_space<vmem>>, vector<1x32xf32>
    %72 = vector.broadcast %71 : vector<1x32xf32> to vector<8x32xf32>
    %73 = arith.addf %70, %72 : vector<8x32xf32>
    %c0_37 = arith.constant 0 : index
    %c0_38 = arith.constant 0 : index
    %74 = vector.load %arg10[%c0_37, %c0_38] : memref<32x32xf32, #tpu.memory_space<vmem>>, vector<32x32xf32>
    %cst_39 = arith.constant dense<0.000000e+00> : vector<8x32xf32>
    %75 = tpu.matmul %73, %74, %cst_39 {dimension_numbers = #tpu.dot_dimension_numbers<[1], [0], [0], [1], [0, 0, 1, 1], [], []>} : vector<8x32xf32>, vector<32x32xf32>, vector<8x32xf32> -> vector<8x32xf32>
    %c0_40 = arith.constant 0 : index
    %c0_41 = arith.constant 0 : index
    %76 = vector.load %arg11[%c0_40, %c0_41] : memref<1x32xf32, #tpu.memory_space<vmem>>, vector<1x32xf32>
    %77 = vector.broadcast %76 : vector<1x32xf32> to vector<8x32xf32>
    %78 = arith.addf %75, %77 : vector<8x32xf32>
    %c0_42 = arith.constant 0 : index
    %c0_43 = arith.constant 0 : index
    %79 = vector.load %arg12[%c0_42, %c0_43] : memref<8x32xf32, #tpu.memory_space<vmem>>, vector<8x32xf32>
    tpu.vector_store %arg12[%c0_42, %c0_43], %78 {strides = array<i32>} : memref<8x32xf32, #tpu.memory_space<vmem>>, vector<8x32xf32>,
    return
  }
  func.func @transform_0(%arg0: i32) -> (i32, i32, i32) {
    %c0_i32 = arith.constant 0 : i32
    %c0_i32_0 = arith.constant 0 : i32
    %c0_i32_1 = arith.constant 0 : i32
    return %arg0, %c0_i32, %c0_i32_0 : i32, i32, i32
  }
  func.func @transform_1(%arg0: i32) -> (i32, i32) {
    %c0_i32 = arith.constant 0 : i32
    %c0_i32_0 = arith.constant 0 : i32
    %c0_i32_1 = arith.constant 0 : i32
    return %c0_i32, %c0_i32_0 : i32, i32
  }
  func.func @transform_2(%arg0: i32) -> (i32, i32) {
    %c0_i32 = arith.constant 0 : i32
    %c0_i32_0 = arith.constant 0 : i32
    %c0_i32_1 = arith.constant 0 : i32
    return %c0_i32, %c0_i32_0 : i32, i32
  }
  func.func @transform_3(%arg0: i32) -> (i32, i32) {
    %c0_i32 = arith.constant 0 : i32
    %c0_i32_0 = arith.constant 0 : i32
    %c0_i32_1 = arith.constant 0 : i32
    return %c0_i32, %c0_i32_0 : i32, i32
  }
  func.func @transform_4(%arg0: i32) -> (i32, i32) {
    %c0_i32 = arith.constant 0 : i32
    %c0_i32_0 = arith.constant 0 : i32
    %c0_i32_1 = arith.constant 0 : i32
    return %c0_i32, %c0_i32_0 : i32, i32
  }
  func.func @transform_5(%arg0: i32) -> (i32, i32) {
    %c0_i32 = arith.constant 0 : i32
    %c0_i32_0 = arith.constant 0 : i32
    %c0_i32_1 = arith.constant 0 : i32
    return %c0_i32, %c0_i32_0 : i32, i32
  }
  func.func @transform_6(%arg0: i32) -> (i32, i32) {
    %c0_i32 = arith.constant 0 : i32
    %c0_i32_0 = arith.constant 0 : i32
    %c0_i32_1 = arith.constant 0 : i32
    return %c0_i32, %c0_i32_0 : i32, i32
  }
  func.func @transform_7(%arg0: i32) -> (i32, i32) {
    %c0_i32 = arith.constant 0 : i32
    %c0_i32_0 = arith.constant 0 : i32
    %c0_i32_1 = arith.constant 0 : i32
    return %c0_i32, %c0_i32_0 : i32, i32
  }
  func.func @transform_8(%arg0: i32) -> (i32, i32) {
    %c0_i32 = arith.constant 0 : i32
    %c0_i32_0 = arith.constant 0 : i32
    %c0_i32_1 = arith.constant 0 : i32
    return %c0_i32, %c0_i32_0 : i32, i32
  }
  func.func @transform_9(%arg0: i32) -> (i32, i32) {
    %c0_i32 = arith.constant 0 : i32
    %c0_i32_0 = arith.constant 0 : i32
    %c0_i32_1 = arith.constant 0 : i32
    return %c0_i32, %c0_i32_0 : i32, i32
  }
  func.func @transform_10(%arg0: i32) -> (i32, i32) {
    %c0_i32 = arith.constant 0 : i32
    %c0_i32_0 = arith.constant 0 : i32
    %c0_i32_1 = arith.constant 0 : i32
    return %c0_i32, %c0_i32_0 : i32, i32
  }
  func.func @transform_11(%arg0: i32) -> (i32, i32) {
    %c0_i32 = arith.constant 0 : i32
    %c0_i32_0 = arith.constant 0 : i32
    return %arg0, %c0_i32 : i32, i32
  }
}

</mosaic_0001>

<bundles_post_ra>
// kernel: tpu_custom_call.1
= control target key start
LH: loop header
LB: loop body
LE: loop exit
PB: predicated region body
PF: predicated region fallthrough
CT: control target
= control target key end

     0   :  { %16 = vsyncpa [#allocation3], 0  ;;  %s5371_s0 = inlined_call_operand.hbm [shape: f32[8,8,32], index: 0, kind: input, shape index: {}]   ;;  %s5372_s1 = inlined_call_operand.hbm [shape: f32[32,96], index: 1, kind: input, shape index: {}]   ;;  %s5373_s2 = inlined_call_operand.vmem [shape: f32[1,96], index: 2, kind: input, shape index: {}]   ;;  %s5374_s3 = inlined_call_operand.hbm [shape: f32[32,32], index: 3, kind: input, shape index: {}]   ;;  %s5375_s4 = inlined_call_operand.vmem [shape: f32[1,32], index: 4, kind: input, shape index: {}]   ;;  %s5376_s5 = inlined_call_operand.hbm [shape: f32[32,96], index: 5, kind: input, shape index: {}]   ;;  %s5377_s6 = inlined_call_operand.vmem [shape: f32[1,96], index: 6, kind: input, shape index: {}]   ;;  %s5378_s7 = inlined_call_operand.hbm [shape: f32[32,32], index: 7, kind: input, shape index: {}]   ;;  %s5379_s8 = inlined_call_operand.vmem [shape: f32[1,32], index: 8, kind: input, shape index: {}]   ;;  %s5380_s9 = inlined_call_operand.hbm [shape: f32[32,32], index: 9, kind: input, shape index: {}]   ;;  %s5381_s10 = inlined_call_operand.vmem [shape: f32[1,32], index: 10, kind: input, shape index: {}]   ;;  %s5382_s11 = inlined_call_operand.hbm [shape: f32[8,32], index: 11, kind: output, shape index: {}]  }
   0x1   :  { %17 = vsyncpa [#allocation6], 0 }
   0x2   :  { %18 = vsyncpa [#allocation9], 0 }
   0x3   :  { %19 = vsyncpa [#allocation12], 0 }
   0x4   :  { %20 = vsyncpa [#allocation4], 0  ;;  %s4777_s17 = smov [#allocation5]   ;;  %s4778_s19 = smov [#allocation8]  }
   0x5   :  { %s38_s18 = sshll.u32 %s4777_s17, 4  ;;  %s66_s20 = sshll.u32 %s4778_s19, 4  ;;  %s39_s18 = int_to_ptr.vmem [resolvable:$true] %s38_s18  ;;  %s67_s20 = int_to_ptr.vmem [resolvable:$true] %s66_s20 }
   0x6   :  { %s4635_s21 = scalar_lea.vmem %s39_s18, 512  ;;  %p4640_p1 = scmp.lt.s32.totalorder %s39_s18, %s39_s18 }
   0x7   :  { %p4636_p0 = scmp.ne.s32.totalorder %s39_s18, %s4635_s21  ;;  %p4641_p2 = scmp.lt.s32.totalorder %s4635_s21, %s4635_s21 }
   0x9   :  { %p4642_p3 = por %p4641_p2, %p4640_p1 }
   0xb   :  { %p4643_p4 = pnand %p4642_p3, %p4636_p0 }
   0xd   :  { %4646 = shalt.err (!%p4643_p4)
}
   0xe   :  { %s4779_s22 = smov 128   ;;  %s4780_s23 = smov 8  }
   0xf   :  { %44 = dma.hbm_to_vmem [thread:$0]  %s5372_s1, 512, %s39_s18, [#allocation6], %s4779_s22, %s4779_s22, %s4780_s23  }
  0x10   :  { %s4655_s26 = scalar_lea.vmem %s67_s20, 512  ;;  %p4660_p6 = scmp.lt.s32.totalorder %s67_s20, %s67_s20 }
  0x11   :  { %p4656_p5 = scmp.ne.s32.totalorder %s67_s20, %s4655_s26  ;;  %p4661_p7 = scmp.lt.s32.totalorder %s4655_s26, %s4655_s26 }
  0x13   :  { %p4662_p8 = por %p4661_p7, %p4660_p6 }
  0x15   :  { %p4663_p9 = pnand %p4662_p8, %p4656_p5 }
  0x17   :  { %4666 = shalt.err (!%p4663_p9)
}
  0x18   :  { %72 = dma.hbm_to_vmem [thread:$0]  %s5376_s5, 512, %s67_s20, [#allocation9], %s4779_s22, %s4779_s22, %s4780_s23  }
  0x19   :  { %s4781_s29 = smov [#allocation2]   ;;  %s4782_s12 = smov [#allocation7]  }
  0x1a   :  { %s26_s30 = sshll.u32 %s4781_s29, 4  ;;  %s52_s13 = sshll.u32 %s4782_s12, 4  ;;  %s27_s30 = int_to_ptr.vmem [resolvable:$true] %s26_s30  ;;  %s53_s13 = int_to_ptr.vmem [resolvable:$true] %s52_s13 }
  0x1b   :  { %s4675_s1 = scalar_lea.vmem %s27_s30, 1024  ;;  %p4680_p11 = scmp.lt.s32.totalorder %s27_s30, %s27_s30 }
  0x1c   :  { %p4676_p10 = scmp.ne.s32.totalorder %s27_s30, %s4675_s1  ;;  %p4681_p12 = scmp.lt.s32.totalorder %s4675_s1, %s4675_s1 }
  0x1e   :  { %p4682_p13 = por %p4681_p12, %p4680_p11 }
  0x20   :  { %p4683_p0 = pnand %p4682_p13, %p4676_p10 }
  0x22   :  { %4686 = shalt.err (!%p4683_p0)
}
  0x23   :  { %32 = dma.hbm_to_vmem [thread:$0]  %s5371_s0, 1024, %s27_s30, [#allocation3], %s4779_s22, %s4779_s22, %s4780_s23  }
  0x24   :  { %s4695_s5 = scalar_lea.vmem %s53_s13, 512  ;;  %p4700_p2 = scmp.lt.s32.totalorder %s53_s13, %s53_s13 }
  0x25   :  { %p4696_p1 = scmp.ne.s32.totalorder %s53_s13, %s4695_s5  ;;  %p4701_p3 = scmp.lt.s32.totalorder %s4695_s5, %s4695_s5 }
  0x27   :  { %p4702_p4 = por %p4701_p3, %p4700_p2 }
  0x29   :  { %p4703_p5 = pnand %p4702_p4, %p4696_p1 }
  0x2b   :  { %4706 = shalt.err (!%p4703_p5)
}
  0x2c   :  { %58 = dma.hbm_to_vmem [thread:$0]  %s5374_s3, 512, %s53_s13, [#allocation6], %s4779_s22, %s4779_s22, %s4780_s23  }
  0x2d   :  { %s4783_s18 = smov [#allocation10]   ;;  %s4784_s20 = smov [#allocation11]  }
  0x2e   :  { %s80_s19 = sshll.u32 %s4783_s18, 4  ;;  %s94_s21 = sshll.u32 %s4784_s20, 4  ;;  %s81_s19 = int_to_ptr.vmem [resolvable:$true] %s80_s19  ;;  %s95_s21 = int_to_ptr.vmem [resolvable:$true] %s94_s21 }
  0x2f   :  { %s4715_s0 = scalar_lea.vmem %s81_s19, 512  ;;  %p4720_p7 = scmp.lt.s32.totalorder %s81_s19, %s81_s19 }
  0x30   :  { %p4716_p6 = scmp.ne.s32.totalorder %s81_s19, %s4715_s0  ;;  %p4721_p8 = scmp.lt.s32.totalorder %s4715_s0, %s4715_s0 }
  0x32   :  { %p4722_p9 = por %p4721_p8, %p4720_p7 }
  0x34   :  { %p4723_p10 = pnand %p4722_p9, %p4716_p6 }
  0x36   :  { %4726 = shalt.err (!%p4723_p10)
}
  0x37   :  { %86 = dma.hbm_to_vmem [thread:$0]  %s5378_s7, 512, %s81_s19, [#allocation9], %s4779_s22, %s4779_s22, %s4780_s23  }
  0x38   :  { %s4735_s3 = scalar_lea.vmem %s95_s21, 512  ;;  %p4740_p12 = scmp.lt.s32.totalorder %s95_s21, %s95_s21 }
  0x39   :  { %p4736_p11 = scmp.ne.s32.totalorder %s95_s21, %s4735_s3  ;;  %p4741_p13 = scmp.lt.s32.totalorder %s4735_s3, %s4735_s3 }
  0x3b   :  { %p4742_p0 = por %p4741_p13, %p4740_p12 }
  0x3d   :  { %p4743_p1 = pnand %p4742_p0, %p4736_p11 }
  0x3f   :  { %4746 = shalt.err (!%p4743_p1)
}
  0x40   :  { %100 = dma.hbm_to_vmem [thread:$0]  %s5380_s9, 512, %s95_s21, [#allocation12], %s4779_s22, %s4779_s22, %s4780_s23  }
  0x41   :  { %4767 = dma.done.wait [#allocation3], 1024  }
  0x42   :  { %4768 = vsyncadd [#allocation3], 4294966272 }
  0x43   :  { %4769 = dma.done.wait [#allocation6], 1024  }
  0x44   :  { %4770 = vsyncadd [#allocation6], 4294966272 }
  0x45   :  { %4771 = dma.done.wait [#allocation9], 1024  }
  0x46   :  { %4772 = vsyncadd [#allocation9], 4294966272 }
  0x47   :  { %4773 = dma.done.wait [#allocation12], 512  }
  0x48   :  { %4774 = vsyncadd [#allocation12], 4294966784  ;;  %v4785_v0 = vmov 0.0   ;;  %vm4786_vm0 = vmmov 0   ;;  %v121_v1 = vld [vmem:[#allocation2] sm:$0xff]  ;;  %vm153_vm1 = vcmask 261120  }
  0x49   :  { %4268 = vmatprep.subr.mxu0 %v4785_v0  ;;  %4270 = vmatprep.mubr.msk.f32.mxu0 %vm4786_vm0, %v4785_v0  ;;  %v123_v2 = vld [vmem:[#allocation2 + $0x10] sm:$0xff]  ;;  %vm129_vm2 = vcmp.ne.f32.partialorder %v121_v1, 0.0  ;;  %v125_v4 = vld [vmem:[#allocation2 + $0x20] sm:$0xff]  ;;  %v741_v9 = vld [vmem:[#allocation5 + $0x18] sm:$0xff]  ;;  %s4787_s22 = smov 96   ;;  %vm1518_vm10 = vcmask 64512  }
  0x4a   :  { %4273 = vmatprep.subr.mxu1 %v4785_v0  ;;  %4275 = vmatprep.mubr.msk.f32.mxu1 %vm4786_vm0, %v4785_v0  ;;  %vm131_vm3 = vcmp.ne.f32.partialorder %v123_v2, 0.0  ;;  %v4039_v3 = vsel %vm129_vm2, 1.0, %v4785_v0  ;;  %vm133_vm4 = vcmp.ne.f32.partialorder %v125_v4, 0.0  ;;  %v127_v6 = vld [vmem:[#allocation2 + $0x30] sm:$0xff]  ;;  %v739_v11 = vld [vmem:[#allocation5 + $0x8] sm:$0xff]  ;;  %v738_v12 = vld [vmem:[#allocation5] sm:$0xff] }
  0x4b   :  { %4269 = vmatpush3.xpose.msk.msra.mxu0 %vm153_vm1, %v4039_v3  ;;  %v4041_v5 = vsel %vm131_vm3, 1.0, %v4785_v0  ;;  %v4043_v7 = vsel %vm133_vm4, 1.0, %v4785_v0  ;;  %vm135_vm5 = vcmp.ne.f32.partialorder %v127_v6, 0.0  ;;  %v740_v10 = vld [vmem:[#allocation5 + $0x10] sm:$0xff]  ;;  %v122_v13 = vld [vmem:[#allocation2 + $0x8] sm:$0xff]  ;;  %v124_v14 = vld [vmem:[#allocation2 + $0x18] sm:$0xff] }
  0x4c   :  { %4278 = vmatprep.subr.mxu0 %v4785_v0  ;;  %v4045_v8 = vsel %vm135_vm5, 1.0, %v4785_v0  ;;  %v126_v15 = vld [vmem:[#allocation2 + $0x28] sm:$0xff]  ;;  %v128_v16 = vld [vmem:[#allocation2 + $0x38] sm:$0xff]  ;;  %vm132_vm6 = vcmp.ne.f32.partialorder %v124_v14, 0.0  ;;  %vm130_vm7 = vcmp.ne.f32.partialorder %v122_v13, 0.0  ;;  %vm3127_vm5 = vcmask 57344  }
  0x4d   :  { %v4040_v17 = vsel %vm130_vm7, 1.0, %v4785_v0  ;;  %v4042_v18 = vsel %vm132_vm6, 1.0, %v4785_v0  ;;  %vm134_vm8 = vcmp.ne.f32.partialorder %v126_v15, 0.0  ;;  %vm136_vm9 = vcmp.ne.f32.partialorder %v128_v16, 0.0  ;;  %v4063_v30 = vld [vmem:[%s5373_s2] ss:$0 sm:$0xff] }
  0x4e   :  { %4271 = vmatmul.mubr.msk.f32.vlgmr.msra.gmra.mxu0 %vm153_vm1, %v4039_v3  ;;  %4274 = vmatpush3.xpose.msk.msra.mxu1 %vm153_vm1, %v4040_v17  ;;  %v4044_v19 = vsel %vm134_vm8, 1.0, %v4785_v0  ;;  %v4046_v20 = vsel %vm136_vm9, 1.0, %v4785_v0  ;;  %s4788_s2 = smov 64   ;;  %vm3847_vm6 = vcmask 1042434   ;;  %vm3850_vm7 = vcmask 1043459   ;;  %s4789_s1 = smov [#allocation13]  }
  0x4f   :  { %4279 = vmatpush3.xpose.msk.msra.mxu0 %vm153_vm1, %v4041_v5  ;;  %4280 = vmatprep.mubr.msk.f32.mxu0 %vm4786_vm0, %v4785_v0  ;;  %vm3853_vm8 = vcmask 1044484   ;;  %vm3856_vm9 = vcmask 1045509   ;;  %s4027_s14 = sshll.u32 %s4789_s1, 4  ;;  %s4028_s14 = int_to_ptr.vmem [resolvable:$true] %s4027_s14 }
  0x50   :  { %4288 = vmatprep.subr.mxu0 %v4785_v0  ;;  %4283 = vmatprep.subr.mxu1 %v4785_v0  ;;  %s4747_s15 = scalar_lea.vmem %s4028_s14, 128  ;;  %p4752_p3 = scmp.lt.s32.totalorder %s4028_s14, %s4028_s14 }
  0x51   :  { %4276 = vmatmul.mubr.msk.f32.vlgmr.msra.gmra.mxu1 %vm153_vm1, %v4040_v17  ;;  %p4748_p2 = scmp.ne.s32.totalorder %s4028_s14, %s4747_s15  ;;  %p4753_p4 = scmp.lt.s32.totalorder %s4747_s15, %s4747_s15 }
  0x52   :  { %4281 = vmatmul.mubr.msk.f32.vlgmr.msra.gmra.mxu0 %vm153_vm1, %v4041_v5  ;;  %4284 = vmatpush3.xpose.msk.msra.mxu1 %vm153_vm1, %v4042_v18 }
  0x53   :  { %4289 = vmatpush3.xpose.msk.msra.mxu0 %vm153_vm1, %v4043_v7  ;;  %4290 = vmatprep.mubr.msk.f32.mxu0 %vm4786_vm0, %v4785_v0  ;;  %p4754_p5 = por %p4753_p4, %p4752_p3 }
  0x54   :  { %4298 = vmatprep.subr.mxu0 %v4785_v0  ;;  %4285 = vmatprep.mubr.msk.f32.mxu1 %vm4786_vm0, %v4785_v0 }
  0x55   :  { %4293 = vmatprep.subr.mxu1 %v4785_v0  ;;  %4286 = vmatmul.mubr.msk.f32.vlgmr.msra.gmra.mxu1 %vm153_vm1, %v4042_v18  ;;  %p4755_p6 = pnand %p4754_p5, %p4748_p2 }
  0x56   :  { %4291 = vmatmul.mubr.msk.f32.vlgmr.msra.gmra.mxu0 %vm153_vm1, %v4043_v7  ;;  %4294 = vmatpush3.xpose.msk.msra.mxu1 %vm153_vm1, %v4044_v19 }
  0x57   :  { %4299 = vmatpush3.xpose.msk.msra.mxu0 %vm153_vm1, %v4045_v8  ;;  %4300 = vmatprep.mubr.msk.f32.mxu0 %vm4786_vm0, %v4785_v0 }
  0x58   :  { %4308 = vmatprep.subr.mxu0 %v741_v9  ;;  %4295 = vmatprep.mubr.msk.f32.mxu1 %vm4786_vm0, %v4785_v0 }
  0x59   :  { %4303 = vmatprep.subr.mxu1 %v4785_v0  ;;  %4296 = vmatmul.mubr.msk.f32.vlgmr.msra.gmra.mxu1 %vm153_vm1, %v4044_v19 }
  0x5a   :  { %4301 = vmatmul.mubr.msk.f32.vlgmr.msra.gmra.mxu0 %vm153_vm1, %v4045_v8  ;;  %4304 = vmatpush3.xpose.msk.msra.mxu1 %vm153_vm1, %v4046_v20 }
  0x5b   :  { %4309 = vmatpush3.msra.mxu0 %v741_v9  ;;  %4316 = vmatprep.mubr.msk.f32.mxu0 %vm153_vm1, %v121_v1 }
  0x5c   :  { %4310 = vmatprep.subr.mxu0 %v740_v10  ;;  %4305 = vmatprep.mubr.msk.f32.mxu1 %vm4786_vm0, %v4785_v0 }
  0x5d   :  { %4311 = vmatpush3.msra.mxu0 %v740_v10  ;;  %4328 = vmatprep.subr.mxu1 %v4785_v0 }
  0x5e   :  { %4312 = vmatprep.subr.mxu0 %v739_v11  ;;  %4306 = vmatmul.mubr.msk.f32.vlgmr.msra.gmra.mxu1 %vm153_vm1, %v4046_v20 }
  0x5f   :  { %4313 = vmatpush3.msra.mxu0 %v739_v11  ;;  %4330 = vmatprep.mubr.msk.f32.mxu1 %vm4786_vm0, %v4785_v0 }
  0x60   :  { %4314 = vmatprep.subr.mxu0 %v738_v12 }
  0x61   :  { %4315 = vmatpush3.msra.mxu0 %v738_v12 }
  0x62   :  { %4317 = vmatmul.mubr.msk.f32.vlgmr.msra.gmra.mxu0 %vm153_vm1, %v122_v13  ;;  %4353 = vmatprep.subr.mxu0 %v4785_v0 }
  0x63   :  { %4319 = vmatprep.mubr.msk.f32.mxu0 %vm153_vm1, %v123_v2 }
  0x66   :  { %4320 = vmatmul.mubr.msk.f32.gmra.mxu0 %vm153_vm1, %v124_v14 }
  0x67   :  { %4322 = vmatprep.mubr.msk.f32.mxu0 %vm153_vm1, %v125_v4 }
  0x6a   :  { %4323 = vmatmul.mubr.msk.f32.gmra.mxu0 %vm153_vm1, %v126_v15 }
  0x6b   :  { %4325 = vmatprep.mubr.msk.f32.mxu0 %vm153_vm1, %v127_v6 }
  0x6e   :  { %4326 = vmatmul.mubr.msk.f32.gmra.mxu0 %vm153_vm1, %v128_v16 }
  0x6f   :  { %4355 = vmatprep.mubr.msk.f32.mxu0 %vm4786_vm0, %v4785_v0 }
 0x10e   :  { %v4948_v21 = vpop.f32.mrf.mxu0 }
 0x10f   :  { %vm1502_vm11 = vcmp.eq.f32.partialorder %v4948_v21, 0.0 }
 0x110   :  { %v4272_v22 = vpop.f32.mrf.mxu0 }
 0x111   :  { %v4991_v46 = vpop.f32.mrf.mxu1 }
 0x112   :  { %v4950_v23 = vpop.f32.mrf.mxu0  ;;  %vm1503_vm12 = vcmp.eq.f32.partialorder %v4991_v46, 0.0 }
 0x113   :  { %v4277_v47 = vpop.f32.mrf.mxu1  ;;  %vm1504_vm13 = vcmp.eq.f32.partialorder %v4950_v23, 0.0 }
 0x114   :  { %v4282_v24 = vpop.f32.mrf.mxu0 }
 0x115   :  { %v4993_v48 = vpop.f32.mrf.mxu1 }
 0x116   :  { %v4952_v25 = vpop.f32.mrf.mxu0  ;;  %vm1505_vm14 = vcmp.eq.f32.partialorder %v4993_v48, 0.0 }
 0x117   :  { %v4287_v49 = vpop.f32.mrf.mxu1  ;;  %vm1506_vm3 = vcmp.eq.f32.partialorder %v4952_v25, 0.0 }
 0x118   :  { %v4292_v26 = vpop.f32.mrf.mxu0 }
 0x119   :  { %v4995_v50 = vpop.f32.mrf.mxu1 }
 0x11a   :  { %v4954_v27 = vpop.f32.mrf.mxu0  ;;  %vm1507_vm15 = vcmp.eq.f32.partialorder %v4995_v50, 0.0 }
 0x11b   :  { %v4297_v51 = vpop.f32.mrf.mxu1  ;;  %vm1508_vm4 = vcmp.eq.f32.partialorder %v4954_v27, 0.0 }
 0x11c   :  { %v4302_v28 = vpop.f32.mrf.mxu0 }
 0x11e   :  { %v4997_v52 = vpop.f32.mrf.mxu1 }
 0x11f   :  { %vm1509_vm2 = vcmp.eq.f32.partialorder %v4997_v52, 0.0 }
 0x120   :  { %v4307_v53 = vpop.f32.mrf.mxu1 }
 0x122   :  { %v4318_v29 = vpop.f32.mrf.mxu0 }
 0x123   :  { %v4963_v35 = vadd.f32 %v4318_v29, %v4063_v30 }
 0x124   :  { %v839_v31 = vpop.f32.mrf.mxu0 }
 0x125   :  { %v4959_v32 = vadd.f32 %v4063_v30, %v839_v31 }
 0x126   :  { %v4321_v33 = vpop.f32.mrf.mxu0 }
 0x127   :  { %879 = vrot.lane.b32.xlu0 %v4959_v32, %s4787_s22  ;;  %v4971_v39 = vadd.f32 %v4321_v33, %v4063_v30 }
 0x128   :  { %v849_v34 = vpop.f32.mrf.mxu0 }
 0x129   :  { %v4965_v36 = vadd.f32 %v4063_v30, %v849_v34 }
 0x12a   :  { %v4324_v37 = vpop.f32.mrf.mxu0 }
 0x12b   :  { %1033 = vrot.lane.b32.xlu1 %v4965_v36, %s4787_s22  ;;  %956 = vrot.lane.b32.xlu0 %v4963_v35, %s4787_s22  ;;  %v4977_v42 = vadd.f32 %v4324_v37, %v4063_v30 }
 0x12c   :  { %v859_v38 = vpop.f32.mrf.mxu0 }
 0x12d   :  { %v4973_v40 = vadd.f32 %v4063_v30, %v859_v38 }
 0x12e   :  { %v4327_v41 = vpop.f32.mrf.mxu0 }
 0x12f   :  { %1110 = vrot.lane.b32.xlu1 %v4971_v39, %s4787_s22  ;;  %1187 = vrot.lane.b32.xlu0 %v4973_v40, %s4787_s22  ;;  %v4985_v45 = vadd.f32 %v4327_v41, %v4063_v30 }
 0x130   :  { %v869_v43 = vpop.f32.mrf.mxu0 }
 0x131   :  { %v4981_v44 = vadd.f32 %v4063_v30, %v869_v43 }
 0x133   :  { %1264 = vrot.lane.b32.xlu1 %v4977_v42, %s4787_s22  ;;  %1341 = vrot.lane.b32.xlu0 %v4981_v44, %s4787_s22 }
 0x137   :  { %1418 = vrot.lane.b32.xlu1 %v4985_v45, %s4787_s22 }
 0x199   :  { %v880_v54 = vpop.permute.xlu0 %879 }
 0x19a   :  { %4329 = vmatpush3.xpose.msk.msra.mxu1 %vm153_vm1, %v880_v54 }
 0x19b   :  { %4333 = vmatprep.subr.mxu1 %v4785_v0 }
 0x19d   :  { %v1034_v55 = vpop.permute.xlu1 %1033  ;;  %4331 = vmatmul.mubr.msk.f32.vlgmr.msra.gmra.mxu1 %vm153_vm1, %v4959_v32  ;;  %v957_v56 = vpop.permute.xlu0 %956 }
 0x19e   :  { %4334 = vmatpush3.xpose.msk.msra.mxu1 %vm153_vm1, %v957_v56  ;;  %4335 = vmatprep.mubr.msk.f32.mxu1 %vm4786_vm0, %v4785_v0 }
 0x19f   :  { %4338 = vmatprep.subr.mxu1 %v4785_v0 }
 0x1a1   :  { %v1111_v57 = vpop.permute.xlu1 %1110  ;;  %4336 = vmatmul.mubr.msk.f32.vlgmr.msra.gmra.mxu1 %vm153_vm1, %v4963_v35  ;;  %v1188_v59 = vpop.permute.xlu0 %1187 }
 0x1a2   :  { %4339 = vmatpush3.xpose.msk.msra.mxu1 %vm153_vm1, %v1034_v55  ;;  %4340 = vmatprep.mubr.msk.f32.mxu1 %vm4786_vm0, %v4785_v0 }
 0x1a3   :  { %4343 = vmatprep.subr.mxu1 %v4785_v0 }
 0x1a5   :  { %v1265_v58 = vpop.permute.xlu1 %1264  ;;  %4341 = vmatmul.mubr.msk.f32.vlgmr.msra.gmra.mxu1 %vm153_vm1, %v4965_v36  ;;  %v1342_v61 = vpop.permute.xlu0 %1341 }
 0x1a6   :  { %4344 = vmatpush3.xpose.msk.msra.mxu1 %vm153_vm1, %v1111_v57  ;;  %4354 = vmatpush3.xpose.msk.msra.mxu0 %vm153_vm1, %v1265_v58 }
 0x1a7   :  { %4345 = vmatprep.mubr.msk.f32.mxu1 %vm4786_vm0, %v4785_v0  ;;  %4363 = vmatprep.subr.mxu0 %v4785_v0 }
 0x1a8   :  { %4348 = vmatprep.subr.mxu1 %v4785_v0 }
 0x1a9   :  { %4356 = vmatmul.mubr.msk.f32.vlgmr.msra.gmra.mxu0 %vm153_vm1, %v4977_v42  ;;  %v1419_v60 = vpop.permute.xlu1 %1418  ;;  %4346 = vmatmul.mubr.msk.f32.vlgmr.msra.gmra.mxu1 %vm153_vm1, %v4971_v39 }
 0x1aa   :  { %4349 = vmatpush3.xpose.msk.msra.mxu1 %vm153_vm1, %v1188_v59  ;;  %4364 = vmatpush3.xpose.msk.msra.mxu0 %vm153_vm1, %v1419_v60 }
 0x1ab   :  { %4350 = vmatprep.mubr.msk.f32.mxu1 %vm4786_vm0, %v4785_v0  ;;  %4365 = vmatprep.mubr.msk.f32.mxu0 %vm4786_vm0, %v4785_v0 }
 0x1ac   :  { %4358 = vmatprep.subr.mxu1 %v4785_v0  ;;  %4373 = vmatprep.subr.mxu0 %v4785_v0 }
 0x1ad   :  { %4351 = vmatmul.mubr.msk.f32.vlgmr.msra.gmra.mxu1 %vm153_vm1, %v4973_v40  ;;  %4366 = vmatmul.mubr.msk.f32.vlgmr.msra.gmra.mxu0 %vm153_vm1, %v4985_v45 }
 0x1ae   :  { %4359 = vmatpush3.xpose.msk.msra.mxu1 %vm153_vm1, %v1342_v61  ;;  %4360 = vmatprep.mubr.msk.f32.mxu1 %vm4786_vm0, %v4785_v0 }
 0x1af   :  { %4368 = vmatprep.subr.mxu1 %v4785_v0  ;;  %4375 = vmatprep.mubr.msk.f32.mxu0 %vm4786_vm0, %v4785_v0 }
 0x1b1   :  { %4361 = vmatmul.mubr.msk.f32.vlgmr.msra.gmra.mxu1 %vm153_vm1, %v4981_v44 }
 0x1b2   :  { %4370 = vmatprep.mubr.msk.f32.mxu1 %vm4786_vm0, %v4785_v0 }
 0x25d   :  { %v951_v62 = vpop.f32.mrf.mxu1 }
 0x25e   :  { %v1494_v63 = vmul.f32 0.17677669, %v951_v62 }
 0x25f   :  { %v4332_v1 = vpop.f32.mrf.mxu1 }
 0x260   :  { %v1510_v2 = vsel %vm1502_vm11, -1e+09, %v1494_v63 }
 0x261   :  { %v1028_v3 = vpop.f32.mrf.mxu1  ;;  %v1519_v4 = vsel %vm1518_vm10, %v1510_v2, -inf }
 0x262   :  { %v1495_v5 = vmul.f32 0.17677669, %v1028_v3  ;;  %1520 = vmax.xlane.f32.xlu0 %v1519_v4 }
 0x263   :  { %v4337_v6 = vpop.f32.mrf.mxu1 }
 0x264   :  { %v1511_v7 = vsel %vm1503_vm12, -1e+09, %v1495_v5 }
 0x265   :  { %v1105_v8 = vpop.f32.mrf.mxu1  ;;  %v1522_v9 = vsel %vm1518_vm10, %v1511_v7, -inf }
 0x266   :  { %v1496_v10 = vmul.f32 0.17677669, %v1105_v8  ;;  %1523 = vmax.xlane.f32.xlu1 %v1522_v9 }
 0x267   :  { %v4342_v11 = vpop.f32.mrf.mxu1 }
 0x268   :  { %v1512_v12 = vsel %vm1504_vm13, -1e+09, %v1496_v10 }
 0x269   :  { %v1182_v13 = vpop.f32.mrf.mxu1  ;;  %v1336_v14 = vpop.f32.mrf.mxu0  ;;  %v1525_v15 = vsel %vm1518_vm10, %v1512_v12, -inf }
 0x26a   :  { %v1497_v16 = vmul.f32 0.17677669, %v1182_v13  ;;  %v1499_v17 = vmul.f32 0.17677669, %v1336_v14  ;;  %1526 = vmax.xlane.f32.xlu0 %v1525_v15 }
 0x26b   :  { %v4347_v18 = vpop.f32.mrf.mxu1  ;;  %v4357_v19 = vpop.f32.mrf.mxu0 }
 0x26c   :  { %v1513_v20 = vsel %vm1505_vm14, -1e+09, %v1497_v16  ;;  %v1515_v29 = vsel %vm1507_vm15, -1e+09, %v1499_v17 }
 0x26d   :  { %v1259_v22 = vpop.f32.mrf.mxu1  ;;  %v1490_v24 = vpop.f32.mrf.mxu0  ;;  %v1528_v26 = vsel %vm1518_vm10, %v1513_v20, -inf  ;;  %v1534_v34 = vsel %vm1518_vm10, %v1515_v29, -inf }
 0x26e   :  { %v1501_v28 = vmul.f32 0.17677669, %v1490_v24  ;;  %1529 = vmax.xlane.f32.xlu0 %v1528_v26  ;;  %v1498_v43 = vmul.f32 0.17677669, %v1259_v22 }
 0x26f   :  { %v4352_v30 = vpop.f32.mrf.mxu1  ;;  %v4367_v31 = vpop.f32.mrf.mxu0 }
 0x270   :  { %v1517_v37 = vsel %vm1509_vm2, -1e+09, %v1501_v28  ;;  %v1514_v49 = vsel %vm1506_vm3, -1e+09, %v1498_v43 }
 0x271   :  { %v1413_v33 = vpop.f32.mrf.mxu1  ;;  %v1540_v41 = vsel %vm1518_vm10, %v1517_v37, -inf  ;;  %v1531_v51 = vsel %vm1518_vm10, %v1514_v49, -inf }
 0x272   :  { %1535 = vmax.xlane.f32.xlu0 %v1534_v34  ;;  %v1500_v47 = vmul.f32 0.17677669, %v1413_v33 }
 0x273   :  { %v4362_v38 = vpop.f32.mrf.mxu1 }
 0x276   :  { %1541 = vmax.xlane.f32.xlu0 %v1540_v41 }
 0x277   :  { %1607 = vrot.lane.b32.xlu1 %v4959_v32, %s4788_s2  ;;  %v1516_v32 = vsel %vm1508_vm4, -1e+09, %v1500_v47 }
 0x27b   :  { %1759 = vrot.lane.b32.xlu1 %v4965_v36, %s4788_s2  ;;  %v1537_v36 = vsel %vm1518_vm10, %v1516_v32, -inf }
 0x28c   :  { %1683 = vrot.lane.b32.xlu0 %v4963_v35, %s4788_s2 }
 0x29f   :  { %1532 = vmax.xlane.f32.xlu1 %v1531_v51 }
 0x2a3   :  { %1538 = vmax.xlane.f32.xlu1 %v1537_v36 }
 0x2b4   :  { %1835 = vrot.lane.b32.xlu1 %v4971_v39, %s4788_s2 }
 0x2eb   :  { %v1521_v35 = vpop.xlane.xlu0 %1520 }
 0x2ec   :  { %v1543_v53 = vsub.f32 %v1510_v2, %v1521_v35 }
 0x2ee   :  { %v1551_v54 = vmul.f32 1.442695, %v1543_v53 }
 0x2ef   :  { %v1524_v55 = vpop.xlane.xlu1 %1523 }
 0x2f0   :  { %4563 = vpow2.f32 %v1551_v54  ;;  %v1544_v56 = vsub.f32 %v1511_v7, %v1524_v55 }
 0x2f2   :  { %v1553_v57 = vmul.f32 1.442695, %v1544_v56 }
 0x2f3   :  { %v1608_v58 = vpop.permute.xlu1 %1607  ;;  %v1527_v59 = vpop.xlane.xlu0 %1526 }
 0x2f4   :  { %4565 = vpow2.f32 %v1553_v57  ;;  %v1545_v60 = vsub.f32 %v1512_v12, %v1527_v59  ;;  %4369 = vmatpush3.msra.mxu1 %v1608_v58 }
 0x2f5   :  { %4378 = vmatprep.subr.mxu1 %v4785_v0 }
 0x2f6   :  { %v1555_v61 = vmul.f32 1.442695, %v1545_v60 }
 0x2f7   :  { %v1530_v62 = vpop.xlane.xlu0 %1529 }
 0x2f8   :  { %4567 = vpow2.f32 %v1555_v61  ;;  %v1546_v3 = vsub.f32 %v1513_v20, %v1530_v62  ;;  %v1760_v20 = vpop.permute.xlu1 %1759 }
 0x2fa   :  { %v1557_v8 = vmul.f32 1.442695, %v1546_v3  ;;  %v2218_v3 = vld [vmem:[#allocation7 + $0x18] sm:$0xff] }
 0x2fb   :  { %v1536_v63 = vpop.xlane.xlu0 %1535 }
 0x2fc   :  { %v1548_v1 = vsub.f32 %v1515_v29, %v1536_v63 }
 0x2fd   :  { %v4564_v39 = vpop.eup %4563 }
 0x2fe   :  { %v1561_v2 = vmul.f32 1.442695, %v1548_v1  ;;  %v1567_v4 = vsel %vm1518_vm10, %v4564_v39, 0.0 }
 0x2ff   :  { %1568 = vadd.xlane.f32.xlu1 %v1567_v4  ;;  %v1542_v5 = vpop.xlane.xlu0 %1541 }
 0x300   :  { %4569 = vpow2.f32 %v1561_v2  ;;  %v1550_v6 = vsub.f32 %v1517_v37, %v1542_v5 }
 0x301   :  { %v4566_v7 = vpop.eup %4565 }
 0x302   :  { %v1565_v9 = vmul.f32 1.442695, %v1550_v6  ;;  %v1570_v10 = vsel %vm1518_vm10, %v4566_v7, 0.0  ;;  %v2217_v6 = vld [vmem:[#allocation7 + $0x10] sm:$0xff] }
 0x303   :  { %1571 = vadd.xlane.f32.xlu0 %v1570_v10  ;;  %v1684_v11 = vpop.permute.xlu0 %1683 }
 0x304   :  { %4571 = vpow2.f32 %v1565_v9  ;;  %4374 = vmatpush3.msra.mxu0 %v1684_v11  ;;  %v2358_v9 = vld [vmem:[#allocation8 + $0x18] sm:$0xff] }
 0x305   :  { %v4568_v12 = vpop.eup %4567  ;;  %4383 = vmatprep.subr.mxu0 %v4785_v0  ;;  %4573 = vpow2.f32 %v1557_v8  ;;  %v2215_v8 = vld [vmem:[#allocation7] sm:$0xff] }
 0x306   :  { %v1573_v13 = vsel %vm1518_vm10, %v4568_v12, 0.0 }
 0x307   :  { %1574 = vadd.xlane.f32.xlu1 %v1573_v13 }
 0x30d   :  { %v5092_v14 = vpop.eup %4569 }
 0x30e   :  { %v1582_v15 = vsel %vm1518_vm10, %v5092_v14, 0.0 }
 0x30f   :  { %1583 = vadd.xlane.f32.xlu0 %v1582_v15 }
 0x311   :  { %v5096_v16 = vpop.eup %4571 }
 0x312   :  { %v1588_v17 = vsel %vm1518_vm10, %v5096_v16, 0.0  ;;  %v4574_v18 = vpop.eup %4573 }
 0x313   :  { %1589 = vadd.xlane.f32.xlu0 %v1588_v17  ;;  %v1576_v19 = vsel %vm1518_vm10, %v4574_v18, 0.0 }
 0x317   :  { %1577 = vadd.xlane.f32.xlu0 %v1576_v19 }
 0x318   :  { %1987 = vrot.lane.b32.xlu1 %v4977_v42, %s4788_s2 }
 0x328   :  { %v1533_v22 = vpop.xlane.xlu1 %1532 }
 0x329   :  { %v1547_v24 = vsub.f32 %v1514_v49, %v1533_v22 }
 0x32b   :  { %v1559_v26 = vmul.f32 1.442695, %v1547_v24 }
 0x32c   :  { %v1539_v28 = vpop.xlane.xlu1 %1538 }
 0x32d   :  { %4575 = vpow2.f32 %v1559_v26  ;;  %v1549_v29 = vsub.f32 %v1516_v32, %v1539_v28  ;;  %1911 = vrot.lane.b32.xlu0 %v4973_v40, %s4788_s2 }
 0x32f   :  { %v1563_v30 = vmul.f32 1.442695, %v1549_v29 }
 0x330   :  { %v1836_v37 = vpop.permute.xlu1 %1835 }
 0x331   :  { %4577 = vpow2.f32 %v1563_v30  ;;  %2063 = vrot.lane.b32.xlu0 %v4981_v44, %s4788_s2  ;;  %v2357_v30 = vld [vmem:[#allocation8 + $0x10] sm:$0xff] }
 0x33a   :  { %v4576_v31 = vpop.eup %4575 }
 0x33b   :  { %v1579_v33 = vsel %vm1518_vm10, %v4576_v31, 0.0 }
 0x33c   :  { %1580 = vadd.xlane.f32.xlu1 %v1579_v33  ;;  %v2355_v33 = vld [vmem:[#allocation8] sm:$0xff] }
 0x33e   :  { %v5108_v42 = vpop.eup %4577 }
 0x33f   :  { %v1585_v34 = vsel %vm1518_vm10, %v5108_v42, 0.0 }
 0x340   :  { %1586 = vadd.xlane.f32.xlu1 %v1585_v34  ;;  %v4096_v34 = vld [vmem:[%s5375_s4] ss:$0 sm:$0xff] }
 0x351   :  { %2139 = vrot.lane.b32.xlu1 %v4985_v45, %s4788_s2 }
 0x388   :  { %v1569_v40 = vpop.xlane.xlu1 %1568 }
 0x389   :  { %4579 = vrcp.f32 %v1569_v40 }
 0x38c   :  { %v1572_v38 = vpop.xlane.xlu0 %1571 }
 0x38d   :  { %4581 = vrcp.f32 %v1572_v38 }
 0x390   :  { %v1575_v41 = vpop.xlane.xlu1 %1574 }
 0x391   :  { %4583 = vrcp.f32 %v1575_v41 }
 0x394   :  { %v1988_v57 = vpop.permute.xlu1 %1987 }
 0x396   :  { %v4580_v44 = vpop.eup %4579 }
 0x397   :  { %v1599_v43 = vmul.f32 %v4580_v44, %v4564_v39 }
 0x398   :  { %v1584_v47 = vpop.xlane.xlu0 %1583 }
 0x399   :  { %4371 = vmatmul.mubr.msk.f32.vlgmr.msra.gmra.mxu1 %vm1518_vm10, %v1599_v43 }
 0x39a   :  { %v4582_v49 = vpop.eup %4581  ;;  %4379 = vmatpush3.msra.mxu1 %v1760_v20  ;;  %4380 = vmatprep.mubr.msk.f32.mxu1 %vm4786_vm0, %v4785_v0 }
 0x39b   :  { %v1600_v51 = vmul.f32 %v4582_v49, %v4566_v7  ;;  %4388 = vmatprep.subr.mxu1 %v4785_v0  ;;  %v2216_v7 = vld [vmem:[#allocation7 + $0x8] sm:$0xff] }
 0x39c   :  { %v1590_v45 = vpop.xlane.xlu0 %1589 }
 0x39d   :  { %4376 = vmatmul.mubr.msk.f32.vlgmr.msra.gmra.mxu0 %vm1518_vm10, %v1600_v51 }
 0x39e   :  { %v4584_v32 = vpop.eup %4583  ;;  %4384 = vmatpush3.msra.mxu0 %v1836_v37  ;;  %4385 = vmatprep.mubr.msk.f32.mxu0 %vm4786_vm0, %v4785_v0 }
 0x39f   :  { %v1601_v36 = vmul.f32 %v4584_v32, %v4568_v12  ;;  %4393 = vmatprep.subr.mxu0 %v4785_v0 }
 0x3a0   :  { %v1578_v35 = vpop.xlane.xlu0 %1577 }
 0x3a1   :  { %4585 = vrcp.f32 %v1578_v35  ;;  %4381 = vmatmul.mubr.msk.f32.vlgmr.msra.gmra.mxu1 %vm1518_vm10, %v1601_v36 }
 0x3a2   :  { %4390 = vmatprep.mubr.msk.f32.mxu1 %vm4786_vm0, %v4785_v0  ;;  %4587 = vrcp.f32 %v1584_v47 }
 0x3a3   :  { %4589 = vrcp.f32 %v1590_v45 }
 0x3a4   :  { %v1912_v53 = vpop.permute.xlu0 %1911 }
 0x3a5   :  { %4389 = vmatpush3.msra.mxu1 %v1912_v53 }
 0x3a6   :  { %4398 = vmatprep.subr.mxu1 %v4785_v0 }
 0x3a8   :  { %v2064_v2 = vpop.permute.xlu0 %2063 }
 0x3ae   :  { %v4586_v54 = vpop.eup %4585 }
 0x3af   :  { %v1602_v55 = vmul.f32 %v4586_v54, %v4574_v18  ;;  %v4588_v56 = vpop.eup %4587 }
 0x3b0   :  { %v1604_v58 = vmul.f32 %v4588_v56, %v5092_v14  ;;  %v4590_v61 = vpop.eup %4589 }
 0x3b1   :  { %4386 = vmatmul.mubr.msk.f32.vlgmr.msra.gmra.mxu0 %vm1518_vm10, %v1602_v55  ;;  %v1606_v63 = vmul.f32 %v4590_v61, %v5096_v16  ;;  %v4105_v55 = vld [vmem:[%s5377_s6] ss:$0 sm:$0xff] }
 0x3b2   :  { %4394 = vmatpush3.msra.mxu0 %v1988_v57  ;;  %4395 = vmatprep.mubr.msk.f32.mxu0 %vm4786_vm0, %v4785_v0 }
 0x3b3   :  { %4403 = vmatprep.subr.mxu0 %v4785_v0 }
 0x3b5   :  { %4396 = vmatmul.mubr.msk.f32.vlgmr.msra.gmra.mxu0 %vm1518_vm10, %v1604_v58 }
 0x3b6   :  { %4405 = vmatprep.mubr.msk.f32.mxu0 %vm4786_vm0, %v4785_v0 }
 0x3c5   :  { %v1581_v59 = vpop.xlane.xlu1 %1580 }
 0x3c6   :  { %4591 = vrcp.f32 %v1581_v59 }
 0x3c9   :  { %v1587_v60 = vpop.xlane.xlu1 %1586 }
 0x3ca   :  { %4593 = vrcp.f32 %v1587_v60 }
 0x3cd   :  { %v2140_v62 = vpop.permute.xlu1 %2139 }
 0x3ce   :  { %4404 = vmatpush3.msra.mxu0 %v2140_v62 }
 0x3cf   :  { %4406 = vmatmul.mubr.msk.f32.vlgmr.msra.gmra.mxu0 %vm1518_vm10, %v1606_v63  ;;  %4428 = vmatprep.subr.mxu0 %v2358_v9 }
 0x3d0   :  { %4429 = vmatpush3.msra.mxu0 %v2358_v9 }
 0x3d1   :  { %4430 = vmatprep.subr.mxu0 %v2357_v30 }
 0x3d2   :  { %4431 = vmatpush3.msra.mxu0 %v2357_v30 }
 0x3d3   :  { %v4592_v1 = vpop.eup %4591 }
 0x3d4   :  { %v1603_v39 = vmul.f32 %v4592_v1, %v4576_v31  ;;  %v2356_v31 = vld [vmem:[#allocation8 + $0x8] sm:$0xff] }
 0x3d5   :  { %4432 = vmatprep.subr.mxu0 %v2356_v31 }
 0x3d6   :  { %4391 = vmatmul.mubr.msk.f32.vlgmr.msra.gmra.mxu1 %vm1518_vm10, %v1603_v39  ;;  %4433 = vmatpush3.msra.mxu0 %v2356_v31 }
 0x3d7   :  { %v4594_v4 = vpop.eup %4593  ;;  %4399 = vmatpush3.msra.mxu1 %v2064_v2  ;;  %4400 = vmatprep.mubr.msk.f32.mxu1 %vm4786_vm0, %v4785_v0 }
 0x3d8   :  { %v1605_v5 = vmul.f32 %v4594_v4, %v5108_v42  ;;  %4408 = vmatprep.subr.mxu1 %v2218_v3  ;;  %4434 = vmatprep.subr.mxu0 %v2355_v33 }
 0x3d9   :  { %4435 = vmatpush3.msra.mxu0 %v2355_v33 }
 0x3da   :  { %4401 = vmatmul.mubr.msk.f32.vlgmr.msra.gmra.mxu1 %vm1518_vm10, %v1605_v5  ;;  %4453 = vmatprep.subr.mxu0 %v4785_v0 }
 0x3db   :  { %4409 = vmatpush3.msra.mxu1 %v2218_v3 }
 0x3dc   :  { %4410 = vmatprep.subr.mxu1 %v2217_v6 }
 0x3dd   :  { %4411 = vmatpush3.msra.mxu1 %v2217_v6 }
 0x3de   :  { %4412 = vmatprep.subr.mxu1 %v2216_v7 }
 0x3df   :  { %4413 = vmatpush3.msra.mxu1 %v2216_v7 }
 0x3e0   :  { %4414 = vmatprep.subr.mxu1 %v2215_v8 }
 0x3e1   :  { %4415 = vmatpush3.msra.mxu1 %v2215_v8 }
 0x3e2   :  { %4448 = vmatprep.subr.mxu1 %v4785_v0 }
 0x459   :  { %v1679_v10 = vpop.f32.mrf.mxu1 }
 0x45a   :  { %4416 = vmatprep.mubr.msk.f32.mxu1 %vm153_vm1, %v1679_v10 }
 0x45b   :  { %v4372_v11 = vpop.f32.mrf.mxu1 }
 0x45d   :  { %v1755_v12 = vpop.f32.mrf.mxu0 }
 0x45e   :  { %4417 = vmatmul.mubr.msk.f32.vlgmr.msra.gmra.mxu1 %vm153_vm1, %v1755_v12 }
 0x45f   :  { %v4377_v13 = vpop.f32.mrf.mxu0 }
 0x461   :  { %v1831_v14 = vpop.f32.mrf.mxu1 }
 0x462   :  { %4419 = vmatprep.mubr.msk.f32.mxu1 %vm153_vm1, %v1831_v14 }
 0x463   :  { %v4382_v15 = vpop.f32.mrf.mxu1 }
 0x471   :  { %v1907_v16 = vpop.f32.mrf.mxu0 }
 0x472   :  { %4420 = vmatmul.mubr.msk.f32.gmra.mxu1 %vm153_vm1, %v1907_v16 }
 0x473   :  { %v4387_v17 = vpop.f32.mrf.mxu0 }
 0x475   :  { %v2059_v18 = vpop.f32.mrf.mxu0 }
 0x477   :  { %v4397_v19 = vpop.f32.mrf.mxu0 }
 0x48f   :  { %v2211_v20 = vpop.f32.mrf.mxu0 }
 0x491   :  { %v4407_v22 = vpop.f32.mrf.mxu0 }
 0x496   :  { %v1983_v24 = vpop.f32.mrf.mxu1 }
 0x497   :  { %4422 = vmatprep.mubr.msk.f32.mxu1 %vm153_vm1, %v1983_v24 }
 0x498   :  { %v4392_v26 = vpop.f32.mrf.mxu1  ;;  %4423 = vmatmul.mubr.msk.f32.gmra.mxu1 %vm153_vm1, %v2059_v18 }
 0x49a   :  { %v2135_v28 = vpop.f32.mrf.mxu1 }
 0x49b   :  { %4425 = vmatprep.mubr.msk.f32.mxu1 %vm153_vm1, %v2135_v28 }
 0x49c   :  { %v4402_v29 = vpop.f32.mrf.mxu1  ;;  %4426 = vmatmul.mubr.msk.f32.gmra.mxu1 %vm153_vm1, %v2211_v20 }
 0x49d   :  { %4450 = vmatprep.mubr.msk.f32.mxu1 %vm4786_vm0, %v4785_v0 }
 0x51e   :  { %v4418_v42 = vpop.f32.mrf.mxu1 }
 0x51f   :  { %v2322_v38 = vadd.f32 %v4418_v42, %v4096_v34 }
 0x520   :  { %v2316_v37 = vpop.f32.mrf.mxu1 }
 0x521   :  { %v2317_v40 = vadd.f32 %v4096_v34, %v2316_v37 }
 0x523   :  { %4436 = vmatprep.mubr.msk.f32.mxu0 %vm153_vm1, %v2317_v40 }
 0x524   :  { %4437 = vmatmul.mubr.msk.f32.vlgmr.msra.gmra.mxu0 %vm153_vm1, %v2322_v38 }
 0x532   :  { %v4421_v41 = vpop.f32.mrf.mxu1 }
 0x533   :  { %v2332_v47 = vadd.f32 %v4421_v41, %v4096_v34 }
 0x534   :  { %v2326_v44 = vpop.f32.mrf.mxu1 }
 0x535   :  { %v2327_v43 = vadd.f32 %v4096_v34, %v2326_v44 }
 0x537   :  { %4439 = vmatprep.mubr.msk.f32.mxu0 %vm153_vm1, %v2327_v43 }
 0x538   :  { %4440 = vmatmul.mubr.msk.f32.gmra.mxu0 %vm153_vm1, %v2332_v47 }
 0x558   :  { %v4424_v49 = vpop.f32.mrf.mxu1 }
 0x559   :  { %v2342_v32 = vadd.f32 %v4424_v49, %v4096_v34 }
 0x55a   :  { %v2336_v51 = vpop.f32.mrf.mxu1 }
 0x55b   :  { %v2337_v45 = vadd.f32 %v4096_v34, %v2336_v51 }
 0x55c   :  { %v4427_v36 = vpop.f32.mrf.mxu1 }
 0x55d   :  { %4442 = vmatprep.mubr.msk.f32.mxu0 %vm153_vm1, %v2337_v45  ;;  %v2352_v54 = vadd.f32 %v4427_v36, %v4096_v34 }
 0x55e   :  { %v2346_v35 = vpop.f32.mrf.mxu1  ;;  %4443 = vmatmul.mubr.msk.f32.gmra.mxu0 %vm153_vm1, %v2342_v32 }
 0x55f   :  { %v2347_v53 = vadd.f32 %v4096_v34, %v2346_v35 }
 0x561   :  { %4445 = vmatprep.mubr.msk.f32.mxu0 %vm153_vm1, %v2347_v53 }
 0x562   :  { %4446 = vmatmul.mubr.msk.f32.gmra.mxu0 %vm153_vm1, %v2352_v54 }
 0x563   :  { %4455 = vmatprep.mubr.msk.f32.mxu0 %vm4786_vm0, %v4785_v0 }
 0x5e4   :  { %v4438_v56 = vpop.f32.mrf.mxu0 }
 0x5e5   :  { %v5169_v57 = vadd.f32 %v4438_v56, %v4105_v55 }
 0x5e6   :  { %v2456_v58 = vpop.f32.mrf.mxu0 }
 0x5e7   :  { %v5171_v59 = vadd.f32 %v4105_v55, %v2456_v58  ;;  %2573 = vrot.lane.b32.xlu1 %v5169_v57, %s4787_s22 }
 0x5e9   :  { %2496 = vrot.lane.b32.xlu0 %v5171_v59, %s4787_s22 }
 0x5f8   :  { %v4441_v60 = vpop.f32.mrf.mxu0 }
 0x5f9   :  { %v5177_v61 = vadd.f32 %v4441_v60, %v4105_v55 }
 0x5fa   :  { %v2466_v62 = vpop.f32.mrf.mxu0 }
 0x5fb   :  { %v5179_v63 = vadd.f32 %v4105_v55, %v2466_v62  ;;  %2727 = vrot.lane.b32.xlu1 %v5177_v61, %s4787_s22 }
 0x5fd   :  { %2650 = vrot.lane.b32.xlu0 %v5179_v63, %s4787_s22 }
 0x61e   :  { %v4444_v1 = vpop.f32.mrf.mxu0 }
 0x61f   :  { %v5185_v39 = vadd.f32 %v4444_v1, %v4105_v55 }
 0x620   :  { %v2476_v3 = vpop.f32.mrf.mxu0 }
 0x621   :  { %v5187_v2 = vadd.f32 %v4105_v55, %v2476_v3  ;;  %2881 = vrot.lane.b32.xlu1 %v5185_v39, %s4787_s22 }
 0x622   :  { %v4447_v4 = vpop.f32.mrf.mxu0 }
 0x623   :  { %v5191_v5 = vadd.f32 %v4447_v4, %v4105_v55  ;;  %2804 = vrot.lane.b32.xlu0 %v5187_v2, %s4787_s22 }
 0x624   :  { %v2486_v6 = vpop.f32.mrf.mxu0 }
 0x625   :  { %v5195_v7 = vadd.f32 %v4105_v55, %v2486_v6  ;;  %3035 = vrot.lane.b32.xlu1 %v5191_v5, %s4787_s22 }
 0x627   :  { %2958 = vrot.lane.b32.xlu0 %v5195_v7, %s4787_s22 }
 0x659   :  { %v2574_v8 = vpop.permute.xlu1 %2573 }
 0x65a   :  { %4454 = vmatpush3.xpose.msk.msra.mxu0 %vm153_vm1, %v2574_v8 }
 0x65b   :  { %v2497_v9 = vpop.permute.xlu0 %2496  ;;  %4463 = vmatprep.subr.mxu0 %v4785_v0 }
 0x65c   :  { %4449 = vmatpush3.xpose.msk.msra.mxu1 %vm153_vm1, %v2497_v9 }
 0x65d   :  { %4456 = vmatmul.mubr.msk.f32.vlgmr.msra.gmra.mxu0 %vm153_vm1, %v5169_v57  ;;  %4458 = vmatprep.subr.mxu1 %v4785_v0 }
 0x65e   :  { %4465 = vmatprep.mubr.msk.f32.mxu0 %vm4786_vm0, %v4785_v0 }
 0x65f   :  { %4451 = vmatmul.mubr.msk.f32.vlgmr.msra.gmra.mxu1 %vm153_vm1, %v5171_v59 }
 0x660   :  { %4460 = vmatprep.mubr.msk.f32.mxu1 %vm4786_vm0, %v4785_v0 }
 0x66d   :  { %v2728_v10 = vpop.permute.xlu1 %2727 }
 0x66e   :  { %4464 = vmatpush3.xpose.msk.msra.mxu0 %vm153_vm1, %v2728_v10 }
 0x66f   :  { %v2651_v11 = vpop.permute.xlu0 %2650  ;;  %4473 = vmatprep.subr.mxu0 %v4785_v0 }
 0x670   :  { %4459 = vmatpush3.xpose.msk.msra.mxu1 %vm153_vm1, %v2651_v11 }
 0x671   :  { %4466 = vmatmul.mubr.msk.f32.vlgmr.msra.gmra.mxu0 %vm153_vm1, %v5177_v61  ;;  %4468 = vmatprep.subr.mxu1 %v4785_v0 }
 0x672   :  { %4475 = vmatprep.mubr.msk.f32.mxu0 %vm4786_vm0, %v4785_v0 }
 0x673   :  { %4461 = vmatmul.mubr.msk.f32.vlgmr.msra.gmra.mxu1 %vm153_vm1, %v5179_v63 }
 0x674   :  { %4470 = vmatprep.mubr.msk.f32.mxu1 %vm4786_vm0, %v4785_v0 }
 0x693   :  { %v2882_v12 = vpop.permute.xlu1 %2881 }
 0x694   :  { %4474 = vmatpush3.xpose.msk.msra.mxu0 %vm153_vm1, %v2882_v12 }
 0x695   :  { %v2805_v13 = vpop.permute.xlu0 %2804  ;;  %4483 = vmatprep.subr.mxu0 %v4785_v0 }
 0x696   :  { %4469 = vmatpush3.xpose.msk.msra.mxu1 %vm153_vm1, %v2805_v13 }
 0x697   :  { %4476 = vmatmul.mubr.msk.f32.vlgmr.msra.gmra.mxu0 %vm153_vm1, %v5185_v39  ;;  %v3036_v14 = vpop.permute.xlu1 %3035  ;;  %4478 = vmatprep.subr.mxu1 %v4785_v0 }
 0x698   :  { %4484 = vmatpush3.xpose.msk.msra.mxu0 %vm153_vm1, %v3036_v14  ;;  %4485 = vmatprep.mubr.msk.f32.mxu0 %vm4786_vm0, %v4785_v0 }
 0x699   :  { %4471 = vmatmul.mubr.msk.f32.vlgmr.msra.gmra.mxu1 %vm153_vm1, %v5187_v2  ;;  %v2959_v15 = vpop.permute.xlu0 %2958  ;;  %4493 = vmatprep.subr.mxu0 %v4785_v0 }
 0x69a   :  { %4479 = vmatpush3.xpose.msk.msra.mxu1 %vm153_vm1, %v2959_v15  ;;  %4480 = vmatprep.mubr.msk.f32.mxu1 %vm4786_vm0, %v4785_v0 }
 0x69b   :  { %4486 = vmatmul.mubr.msk.f32.vlgmr.msra.gmra.mxu0 %vm153_vm1, %v5191_v5  ;;  %4488 = vmatprep.subr.mxu1 %v4785_v0 }
 0x69c   :  { %4495 = vmatprep.mubr.msk.f32.mxu0 %vm4786_vm0, %v4785_v0 }
 0x69d   :  { %4481 = vmatmul.mubr.msk.f32.vlgmr.msra.gmra.mxu1 %vm153_vm1, %v5195_v7 }
 0x69e   :  { %4490 = vmatprep.mubr.msk.f32.mxu1 %vm4786_vm0, %v4785_v0 }
 0x71d   :  { %v2645_v16 = vpop.f32.mrf.mxu0 }
 0x71e   :  { %v3112_v17 = vmul.f32 0.17677669, %v2645_v16 }
 0x71f   :  { %v2568_v18 = vpop.f32.mrf.mxu1  ;;  %v4457_v19 = vpop.f32.mrf.mxu0 }
 0x720   :  { %v3111_v20 = vmul.f32 0.17677669, %v2568_v18  ;;  %v3120_v22 = vsel %vm1503_vm12, -1e+09, %v3112_v17 }
 0x721   :  { %v4452_v24 = vpop.f32.mrf.mxu1  ;;  %v3131_v26 = vsel %vm3127_vm5, %v3120_v22, -inf }
 0x722   :  { %3132 = vmax.xlane.f32.xlu1 %v3131_v26  ;;  %v3119_v28 = vsel %vm1502_vm11, -1e+09, %v3111_v20  ;;  %vm3862_vm11 = vcmask 1047559  }
 0x723   :  { %v3128_v29 = vsel %vm3127_vm5, %v3119_v28, -inf }
 0x724   :  { %3129 = vmax.xlane.f32.xlu0 %v3128_v29 }
 0x731   :  { %v2799_v30 = vpop.f32.mrf.mxu0 }
 0x732   :  { %v3114_v42 = vmul.f32 0.17677669, %v2799_v30 }
 0x733   :  { %v2722_v31 = vpop.f32.mrf.mxu1  ;;  %v4467_v33 = vpop.f32.mrf.mxu0 }
 0x734   :  { %v3113_v34 = vmul.f32 0.17677669, %v2722_v31  ;;  %v3122_v38 = vsel %vm1505_vm14, -1e+09, %v3114_v42 }
 0x735   :  { %v4462_v37 = vpop.f32.mrf.mxu1  ;;  %v3137_v21 = vsel %vm3127_vm5, %v3122_v38, -inf }
 0x736   :  { %v3121_v46 = vsel %vm1504_vm13, -1e+09, %v3113_v34 }
 0x737   :  { %v3134_v40 = vsel %vm3127_vm5, %v3121_v46, -inf }
 0x738   :  { %3135 = vmax.xlane.f32.xlu0 %v3134_v40 }
 0x73c   :  { %3138 = vmax.xlane.f32.xlu0 %v3137_v21 }
 0x757   :  { %v2953_v41 = vpop.f32.mrf.mxu0 }
 0x758   :  { %v3116_v44 = vmul.f32 0.17677669, %v2953_v41 }
 0x759   :  { %v2876_v43 = vpop.f32.mrf.mxu1  ;;  %v4477_v47 = vpop.f32.mrf.mxu0 }
 0x75a   :  { %v3115_v49 = vmul.f32 0.17677669, %v2876_v43  ;;  %v3124_v51 = vsel %vm1507_vm15, -1e+09, %v3116_v44 }
 0x75b   :  { %v4472_v45 = vpop.f32.mrf.mxu1  ;;  %v3107_v23 = vpop.f32.mrf.mxu0  ;;  %v3143_v32 = vsel %vm3127_vm5, %v3124_v51, -inf }
 0x75c   :  { %v3118_v36 = vmul.f32 0.17677669, %v3107_v23  ;;  %3144 = vmax.xlane.f32.xlu0 %v3143_v32  ;;  %v3123_v48 = vsel %vm1506_vm3, -1e+09, %v3115_v49 }
 0x75d   :  { %v3030_v35 = vpop.f32.mrf.mxu1  ;;  %v4487_v53 = vpop.f32.mrf.mxu0  ;;  %v3140_v54 = vsel %vm3127_vm5, %v3123_v48, -inf }
 0x75e   :  { %v3117_v55 = vmul.f32 0.17677669, %v3030_v35  ;;  %3141 = vmax.xlane.f32.xlu1 %v3140_v54  ;;  %v3126_v56 = vsel %vm1509_vm2, -1e+09, %v3118_v36 }
 0x75f   :  { %v4482_v50 = vpop.f32.mrf.mxu1  ;;  %v3149_v58 = vsel %vm3127_vm5, %v3126_v56, -inf }
 0x760   :  { %3150 = vmax.xlane.f32.xlu0 %v3149_v58  ;;  %v3125_v60 = vsel %vm1508_vm4, -1e+09, %v3117_v55 }
 0x761   :  { %v3146_v62 = vsel %vm3127_vm5, %v3125_v60, -inf }
 0x762   :  { %3147 = vmax.xlane.f32.xlu1 %v3146_v62 }
 0x773   :  { %3216 = vrot.lane.b32.xlu1 %v5171_v59, %s4788_s2 }
 0x776   :  { %3292 = vrot.lane.b32.xlu0 %v5169_v57, %s4788_s2 }
 0x777   :  { %3368 = vrot.lane.b32.xlu1 %v5179_v63, %s4788_s2 }
 0x77a   :  { %3520 = vrot.lane.b32.xlu0 %v5187_v2, %s4788_s2 }
 0x77b   :  { %3444 = vrot.lane.b32.xlu1 %v5177_v61, %s4788_s2 }
 0x77f   :  { %3596 = vrot.lane.b32.xlu1 %v5185_v39, %s4788_s2 }
 0x7ab   :  { %v3133_v25 = vpop.xlane.xlu1 %3132 }
 0x7ac   :  { %v3153_v27 = vsub.f32 %v3120_v22, %v3133_v25 }
 0x7ad   :  { %v3130_v52 = vpop.xlane.xlu0 %3129 }
 0x7ae   :  { %v3162_v1 = vmul.f32 1.442695, %v3153_v27  ;;  %v3152_v59 = vsub.f32 %v3119_v28, %v3130_v52 }
 0x7b0   :  { %4595 = vpow2.f32 %v3162_v1  ;;  %v3160_v3 = vmul.f32 1.442695, %v3152_v59 }
 0x7b2   :  { %4597 = vpow2.f32 %v3160_v3 }
 0x7bd   :  { %v5285_v57 = vpop.eup %4595 }
 0x7be   :  { %v3179_v63 = vsel %vm3127_vm5, %v5285_v57, 0.0 }
 0x7bf   :  { %v5289_v2 = vpop.eup %4597  ;;  %3180 = vadd.xlane.f32.xlu0 %v3179_v63 }
 0x7c0   :  { %v3176_v61 = vsel %vm3127_vm5, %v5289_v2, 0.0 }
 0x7c1   :  { %3177 = vadd.xlane.f32.xlu1 %v3176_v61  ;;  %v3136_v39 = vpop.xlane.xlu0 %3135  ;;  %v3827_v61 = vld [vmem:[#allocation10 + $0x18] sm:$0xff] }
 0x7c2   :  { %v3154_v4 = vsub.f32 %v3121_v46, %v3136_v39  ;;  %v3826_v39 = vld [vmem:[#allocation10 + $0x10] sm:$0xff] }
 0x7c4   :  { %v3164_v6 = vmul.f32 1.442695, %v3154_v4  ;;  %v3825_v4 = vld [vmem:[#allocation10 + $0x8] sm:$0xff] }
 0x7c5   :  { %v3139_v8 = vpop.xlane.xlu0 %3138 }
 0x7c6   :  { %4599 = vpow2.f32 %v3164_v6  ;;  %v3155_v9 = vsub.f32 %v3122_v38, %v3139_v8  ;;  %v3824_v6 = vld [vmem:[#allocation10] sm:$0xff]  ;;  %v3939_v8 = vld [vmem:[#allocation11 + $0x18] sm:$0xff] }
 0x7c8   :  { %v3166_v10 = vmul.f32 1.442695, %v3155_v9  ;;  %v3938_v9 = vld [vmem:[#allocation11 + $0x10] sm:$0xff] }
 0x7ca   :  { %4601 = vpow2.f32 %v3166_v10 }
 0x7d3   :  { %v5293_v11 = vpop.eup %4599 }
 0x7d4   :  { %v3182_v12 = vsel %vm3127_vm5, %v5293_v11, 0.0 }
 0x7d5   :  { %3183 = vadd.xlane.f32.xlu1 %v3182_v12 }
 0x7d7   :  { %v5297_v13 = vpop.eup %4601 }
 0x7d8   :  { %v3185_v14 = vsel %vm3127_vm5, %v5297_v13, 0.0 }
 0x7d9   :  { %3186 = vadd.xlane.f32.xlu0 %v3185_v14 }
 0x7e5   :  { %v3145_v15 = vpop.xlane.xlu0 %3144 }
 0x7e6   :  { %v3157_v16 = vsub.f32 %v3124_v51, %v3145_v15 }
 0x7e7   :  { %v3142_v17 = vpop.xlane.xlu1 %3141 }
 0x7e8   :  { %v3170_v18 = vmul.f32 1.442695, %v3157_v16  ;;  %v3156_v19 = vsub.f32 %v3123_v48, %v3142_v17 }
 0x7e9   :  { %v3151_v20 = vpop.xlane.xlu0 %3150 }
 0x7ea   :  { %4603 = vpow2.f32 %v3170_v18  ;;  %v3168_v22 = vmul.f32 1.442695, %v3156_v19  ;;  %v3159_v24 = vsub.f32 %v3126_v56, %v3151_v20 }
 0x7eb   :  { %v3148_v26 = vpop.xlane.xlu1 %3147 }
 0x7ec   :  { %4605 = vpow2.f32 %v3168_v22  ;;  %v3174_v28 = vmul.f32 1.442695, %v3159_v24  ;;  %v3158_v29 = vsub.f32 %v3125_v60, %v3148_v26 }
 0x7ed   :  { %v3293_v30 = vpop.permute.xlu0 %3292 }
 0x7ee   :  { %4607 = vpow2.f32 %v3174_v28  ;;  %v3172_v31 = vmul.f32 1.442695, %v3158_v29  ;;  %4494 = vmatpush3.msra.mxu0 %v3293_v30 }
 0x7ef   :  { %v3217_v33 = vpop.permute.xlu1 %3216  ;;  %4503 = vmatprep.subr.mxu0 %v4785_v0 }
 0x7f0   :  { %4609 = vpow2.f32 %v3172_v31  ;;  %4489 = vmatpush3.msra.mxu1 %v3217_v33 }
 0x7f1   :  { %4498 = vmatprep.subr.mxu1 %v4785_v0  ;;  %v3521_v47 = vpop.permute.xlu0 %3520 }
 0x7f3   :  { %v3369_v44 = vpop.permute.xlu1 %3368 }
 0x7f7   :  { %v4604_v42 = vpop.eup %4603  ;;  %v3445_v43 = vpop.permute.xlu1 %3444 }
 0x7f8   :  { %v3191_v34 = vsel %vm3127_vm5, %v4604_v42, 0.0 }
 0x7f9   :  { %v4606_v37 = vpop.eup %4605  ;;  %3192 = vadd.xlane.f32.xlu0 %v3191_v34 }
 0x7fa   :  { %v3188_v46 = vsel %vm3127_vm5, %v4606_v37, 0.0 }
 0x7fb   :  { %v5305_v40 = vpop.eup %4607  ;;  %3189 = vadd.xlane.f32.xlu1 %v3188_v46  ;;  %v3597_v49 = vpop.permute.xlu1 %3596 }
 0x7fc   :  { %v3197_v38 = vsel %vm3127_vm5, %v5305_v40, 0.0 }
 0x7fd   :  { %v5309_v21 = vpop.eup %4609  ;;  %3198 = vadd.xlane.f32.xlu0 %v3197_v38 }
 0x7fe   :  { %v3194_v41 = vsel %vm3127_vm5, %v5309_v21, 0.0 }
 0x7ff   :  { %3195 = vadd.xlane.f32.xlu1 %v3194_v41 }
 0x810   :  { %3748 = vrot.lane.b32.xlu1 %v5191_v5, %s4788_s2 }
 0x813   :  { %3672 = vrot.lane.b32.xlu0 %v5195_v7, %s4788_s2 }
 0x848   :  { %v3181_v51 = vpop.xlane.xlu0 %3180 }
 0x849   :  { %4611 = vrcp.f32 %v3181_v51  ;;  %v3936_v51 = vld [vmem:[#allocation11] sm:$0xff] }
 0x84a   :  { %v3178_v45 = vpop.xlane.xlu1 %3177 }
 0x84b   :  { %4613 = vrcp.f32 %v3178_v45  ;;  %v4138_v45 = vld [vmem:[%s5379_s8] ss:$0 sm:$0xff] }
 0x856   :  { %v4612_v23 = vpop.eup %4611 }
 0x857   :  { %v3209_v32 = vmul.f32 %v4612_v23, %v5285_v57 }
 0x858   :  { %v4614_v36 = vpop.eup %4613 }
 0x859   :  { %4496 = vmatmul.mubr.msk.f32.vlgmr.msra.gmra.mxu0 %vm1518_vm10, %v3209_v32  ;;  %v3208_v48 = vmul.f32 %v4614_v36, %v5289_v2 }
 0x85a   :  { %4504 = vmatpush3.msra.mxu0 %v3445_v43  ;;  %4505 = vmatprep.mubr.msk.f32.mxu0 %vm4786_vm0, %v4785_v0 }
 0x85b   :  { %4491 = vmatmul.mubr.msk.f32.vlgmr.msra.gmra.mxu1 %vm1518_vm10, %v3208_v48  ;;  %4513 = vmatprep.subr.mxu0 %v4785_v0  ;;  %v4140_v48 = vld [vmem:[%s5381_s10] ss:$0 sm:$0xff] }
 0x85c   :  { %4499 = vmatpush3.msra.mxu1 %v3369_v44  ;;  %4500 = vmatprep.mubr.msk.f32.mxu1 %vm4786_vm0, %v4785_v0 }
 0x85d   :  { %4508 = vmatprep.subr.mxu1 %v4785_v0 }
 0x85e   :  { %v3184_v5 = vpop.xlane.xlu1 %3183 }
 0x85f   :  { %4615 = vrcp.f32 %v3184_v5 }
 0x862   :  { %v3187_v7 = vpop.xlane.xlu0 %3186 }
 0x863   :  { %4617 = vrcp.f32 %v3187_v7 }
 0x86c   :  { %v4616_v35 = vpop.eup %4615 }
 0x86d   :  { %v3210_v53 = vmul.f32 %v4616_v35, %v5293_v11 }
 0x86f   :  { %4501 = vmatmul.mubr.msk.f32.vlgmr.msra.gmra.mxu1 %vm1518_vm10, %v3210_v53 }
 0x870   :  { %v4618_v54 = vpop.eup %4617  ;;  %4509 = vmatpush3.msra.mxu1 %v3521_v47  ;;  %4510 = vmatprep.mubr.msk.f32.mxu1 %vm4786_vm0, %v4785_v0 }
 0x871   :  { %v3211_v55 = vmul.f32 %v4618_v54, %v5297_v13  ;;  %4518 = vmatprep.subr.mxu1 %v4785_v0 }
 0x873   :  { %4506 = vmatmul.mubr.msk.f32.vlgmr.msra.gmra.mxu0 %vm1518_vm10, %v3211_v55 }
 0x874   :  { %4514 = vmatpush3.msra.mxu0 %v3597_v49  ;;  %4515 = vmatprep.mubr.msk.f32.mxu0 %vm4786_vm0, %v4785_v0  ;;  %v3937_v49 = vld [vmem:[#allocation11 + $0x8] sm:$0xff] }
 0x875   :  { %4523 = vmatprep.subr.mxu0 %v4785_v0 }
 0x882   :  { %v3193_v56 = vpop.xlane.xlu0 %3192 }
 0x883   :  { %4619 = vrcp.f32 %v3193_v56 }
 0x884   :  { %v3190_v50 = vpop.xlane.xlu1 %3189 }
 0x885   :  { %4621 = vrcp.f32 %v3190_v50 }
 0x886   :  { %v3199_v58 = vpop.xlane.xlu0 %3198 }
 0x887   :  { %4623 = vrcp.f32 %v3199_v58 }
 0x888   :  { %v3196_v60 = vpop.xlane.xlu1 %3195 }
 0x889   :  { %4625 = vrcp.f32 %v3196_v60 }
 0x88a   :  { %v3673_v3 = vpop.permute.xlu0 %3672 }
 0x88c   :  { %v3749_v52 = vpop.permute.xlu1 %3748 }
 0x890   :  { %v4620_v62 = vpop.eup %4619 }
 0x891   :  { %v3213_v25 = vmul.f32 %v4620_v62, %v4604_v42 }
 0x892   :  { %v4622_v27 = vpop.eup %4621 }
 0x893   :  { %4516 = vmatmul.mubr.msk.f32.vlgmr.msra.gmra.mxu0 %vm1518_vm10, %v3213_v25  ;;  %v3212_v1 = vmul.f32 %v4622_v27, %v4606_v37 }
 0x894   :  { %v4624_v59 = vpop.eup %4623  ;;  %4524 = vmatpush3.msra.mxu0 %v3749_v52  ;;  %4525 = vmatprep.mubr.msk.f32.mxu0 %vm4786_vm0, %v4785_v0 }
 0x895   :  { %4511 = vmatmul.mubr.msk.f32.vlgmr.msra.gmra.mxu1 %vm1518_vm10, %v3212_v1  ;;  %v3215_v57 = vmul.f32 %v4624_v59, %v5305_v40  ;;  %4539 = vmatprep.subr.mxu0 %v4785_v0 }
 0x896   :  { %v4626_v63 = vpop.eup %4625  ;;  %4519 = vmatpush3.msra.mxu1 %v3673_v3  ;;  %4520 = vmatprep.mubr.msk.f32.mxu1 %vm4786_vm0, %v4785_v0 }
 0x897   :  { %4526 = vmatmul.mubr.msk.f32.vlgmr.msra.gmra.mxu0 %vm1518_vm10, %v3215_v57  ;;  %v3214_v2 = vmul.f32 %v4626_v63, %v5309_v21  ;;  %4528 = vmatprep.subr.mxu1 %v4785_v0 }
 0x898   :  { %4547 = vmatprep.mubr.msk.f32.mxu0 %vm4786_vm0, %v4785_v0  ;;  %4540 = vmatpush3.msra.mxu0 %v3939_v8 }
 0x899   :  { %4521 = vmatmul.mubr.msk.f32.vlgmr.msra.gmra.mxu1 %vm1518_vm10, %v3214_v2  ;;  %4541 = vmatprep.subr.mxu0 %v4785_v0  ;;  %vm3859_vm10 = vcmask 1046534  }
 0x89a   :  { %4536 = vmatprep.mubr.msk.f32.mxu1 %vm4786_vm0, %v4785_v0  ;;  %4529 = vmatpush3.msra.mxu1 %v3827_v61  ;;  %vm3844_vm0 = vcmask 1041409  }
 0x89b   :  { %4530 = vmatprep.subr.mxu1 %v4785_v0  ;;  %4542 = vmatpush3.msra.mxu0 %v3938_v9 }
 0x89c   :  { %4531 = vmatpush3.msra.mxu1 %v3826_v39  ;;  %4543 = vmatprep.subr.mxu0 %v4785_v0 }
 0x89d   :  { %4532 = vmatprep.subr.mxu1 %v4785_v0  ;;  %4544 = vmatpush3.msra.mxu0 %v3937_v49 }
 0x89e   :  { %4533 = vmatpush3.msra.mxu1 %v3825_v4  ;;  %4545 = vmatprep.subr.mxu0 %v4785_v0 }
 0x89f   :  { %4534 = vmatprep.subr.mxu1 %v4785_v0  ;;  %4546 = vmatpush3.msra.mxu0 %v3936_v51 }
 0x8a0   :  { %4535 = vmatpush3.msra.mxu1 %v3824_v6 }
 0x919   :  { %v3364_v10 = vpop.f32.mrf.mxu0 }
 0x91a   :  { %v3843_v18 = vrot.slane %v3364_v10, 7 }
 0x91b   :  { %v3288_v11 = vpop.f32.mrf.mxu1  ;;  %v4497_v12 = vpop.f32.mrf.mxu0 }
 0x91c   :  { %v3845_v24 = vsel %vm3844_vm0, %v3843_v18, %v3288_v11 }
 0x91d   :  { %v4492_v13 = vpop.f32.mrf.mxu1 }
 0x92f   :  { %v3440_v14 = vpop.f32.mrf.mxu1 }
 0x930   :  { %v3846_v19 = vrot.slane %v3440_v14, 6 }
 0x931   :  { %v4502_v15 = vpop.f32.mrf.mxu1 }
 0x932   :  { %v3848_v29 = vsel %vm3847_vm6, %v3846_v19, %v3845_v24 }
 0x933   :  { %v3516_v16 = vpop.f32.mrf.mxu0 }
 0x934   :  { %v3849_v20 = vrot.slane %v3516_v16, 5 }
 0x935   :  { %v4507_v17 = vpop.f32.mrf.mxu0 }
 0x936   :  { %v3851_v31 = vsel %vm3850_vm7, %v3849_v20, %v3848_v29 }
 0x953   :  { %v3668_v22 = vpop.f32.mrf.mxu0 }
 0x954   :  { %v3855_v37 = vrot.slane %v3668_v22, 3 }
 0x955   :  { %v3592_v26 = vpop.f32.mrf.mxu1  ;;  %v4517_v28 = vpop.f32.mrf.mxu0 }
 0x956   :  { %v3852_v30 = vrot.slane %v3592_v26, 4 }
 0x957   :  { %v4512_v33 = vpop.f32.mrf.mxu1  ;;  %v3820_v42 = vpop.f32.mrf.mxu0 }
 0x958   :  { %v3854_v34 = vsel %vm3853_vm8, %v3852_v30, %v3851_v31  ;;  %v3861_v21 = vrot.slane %v3820_v42, 1 }
 0x959   :  { %v3744_v46 = vpop.f32.mrf.mxu1  ;;  %v4527_v40 = vpop.f32.mrf.mxu0  ;;  %v3857_v41 = vsel %vm3856_vm9, %v3855_v37, %v3854_v34 }
 0x95a   :  { %v3858_v38 = vrot.slane %v3744_v46, 2 }
 0x95b   :  { %v4522_v44 = vpop.f32.mrf.mxu1 }
 0x95c   :  { %v3860_v43 = vsel %vm3859_vm10, %v3858_v38, %v3857_v41 }
 0x95d   :  { %v3863_v47 = vsel %vm3862_vm11, %v3861_v21, %v3860_v43 }
 0x95e   :  { %4537 = vmatmul.mubr.msk.f32.vlgmr.msra.gmra.mxu1 %vm153_vm1, %v3863_v47 }
 0xa1e   :  { %v3932_v23 = vpop.f32.mrf.mxu1 }
 0xa1f   :  { %v3933_v32 = vadd.f32 %v4138_v45, %v3932_v23 }
 0xa20   :  { %v4538_v36 = vpop.f32.mrf.mxu1 }
 0xa21   :  { %4548 = vmatmul.mubr.msk.f32.vlgmr.msra.gmra.mxu0 %vm153_vm1, %v3933_v32 }
 0xae1   :  { %v4016_v5 = vpop.f32.mrf.mxu0 }
 0xae2   :  { %v4017_v7 = vadd.f32 %v4140_v48, %v4016_v5 }
 0xae3   :  { %v4549_v0 = vpop.f32.mrf.mxu0 }
 0xae4   :  { %4020 = vst.msk [vmem:[#allocation13] sm:$0xff] %vm153_vm1, %v4017_v7 }
 0xae5   :  { %4758 = shalt.err (!%p4755_p6)
}
 0xae6   :  { %4030 = dma.vmem_to_hbm [thread:$0]  %s4028_s14, 128, %s5382_s11, [#allocation4]  }
 0xae7   :  { %4775 = dma.done.wait [#allocation4], 128  }
 0xae8   :  { %4776 = vsyncadd [#allocation4], 4294967168 }
 0xae9   :  { %4034 = vsyncpa [#allocation3], 1 }
 0xaea   :  { %4035 = vsyncpa [#allocation6], 1 }
 0xaeb   :  { %4036 = vsyncpa [#allocation9], 1 }
 0xaec   :  { %4037 = vsyncpa [#allocation12], 1 }
 0xaed   :  { %4038 = vsyncpa [#allocation4], 1 }

</bundles_post_ra>
